<compile_context>
chip_gen: v7x
topology: tpu7x:2x2x1
jax: 0.10.0
libtpu: 0.0.40
codegen_flags: <defaults>
</compile_context>

<pallas_src>
import jax
import jax.numpy as jnp
from jax.experimental import pallas as pl
from jax.experimental.pallas import tpu as pltpu

NUM_CLASSES = 32
NUM_FEATURES = 16
HIDDEN_DIM = 294
BN_EPS = 1e-5

# Lane-dense padded widths (multiples of 128).
FEAT_PAD = 128   # 16  -> 128
HID_PAD = 384    # 294 -> 384
STEM_OUT = 256
C_PAD = 128      # 128/64/32/64 block channels -> 128
CLS_PAD = 128    # 32 classes -> 128 (sliced off after the kernel)

RESNET_CONFIG = [(128, 2), (64, 2), (32, 2), (64, 2)]


def _block_layout():
    layout = []
    inch = 256
    for ch, stride in RESNET_CONFIG:
        for s in (stride, 1):
            layout.append((inch, ch, s))
            inch = ch
    return tuple(layout)


BLOCK_LAYOUT = _block_layout()                                   # 8 blocks
HAS_PROJ = tuple(s != 1 or ci != co for (ci, co, s) in BLOCK_LAYOUT)


# ---------------------------------------------------------------------------
# The single fused Pallas kernel
# ---------------------------------------------------------------------------
def _make_fused_kernel(has_proj):
    n_blocks = len(has_proj)

    def kernel(*refs):
        a_ref, x_ref, gcn_w, gcn_b, stem_w, stem_s = refs[:6]
        fc_w = refs[6 + 4 * n_blocks]
        fc_b = refs[7 + 4 * n_blocks]
        o_ref = refs[-1]

        def mm(act, w_ref):
            # bf16 MXU matmul with f32 accumulation.
            return jnp.dot(act.astype(jnp.bfloat16), w_ref[...],
                           preferred_element_type=jnp.float32)

        # ---- GCN layer: h = ReLU(A_norm (X W) + b) ----
        # TODO(synk): F.dropout(p=0.5) (training default) treated as identity.
        xw = jnp.dot(x_ref[...], gcn_w[...], preferred_element_type=jnp.float32)
        h = jnp.dot(a_ref[...], xw.astype(jnp.bfloat16),
                    preferred_element_type=jnp.float32)
        h = jnp.maximum(h + gcn_b[...], 0.0)

        # ---- ResNet stem: Conv1d(294,256)+BN+ReLU; MaxPool1d(3,1,1) on L=1 = id ----
        out = jnp.maximum(mm(h, stem_w) + stem_s[...], 0.0)

        # ---- 8 ResBlocks ----
        for bi in range(n_blocks):
            w1 = refs[6 + 4 * bi]   # [cin_pad, C_PAD] or [cin_pad, 2*C_PAD] (|proj)
            s1 = refs[7 + 4 * bi]
            w2 = refs[8 + 4 * bi]
            s2 = refs[9 + 4 * bi]

            y = mm(out, w1) + s1[...]
            if has_proj[bi]:
                c = w2.shape[0]                  # padded channel width
                left = jnp.maximum(y[:, :c], 0.0)     # conv1+BN1+ReLU
                sc = y[:, c:]                          # shortcut conv1x1+BN
            else:
                left = jnp.maximum(y, 0.0)
                sc = out                               # identity shortcut
            left = jnp.maximum(mm(left, w2) + s2[...], 0.0)   # conv2+BN2+ReLU
            out = jnp.maximum(left + sc, 0.0)                  # residual + ReLU

        # ---- flatten ([N,64,1] -> [N,64]) + fc ----
        o_ref[...] = (mm(out, fc_w) + fc_b[...]).astype(o_ref.dtype)

    return kernel


_FUSED_KERNEL = _make_fused_kernel(HAS_PROJ)


# ---------------------------------------------------------------------------
# Deterministic parameter construction (shapes follow the PyTorch __init__),
# with eval-mode BN folded into the weights and all dims zero-padded.
# ---------------------------------------------------------------------------
def init_conv_bn(key, cin, cout, ksize, cin_pad, cout_pad):
    kw, kg, kb, km, kv = jax.random.split(key, 5)
    w = 0.05 * jax.random.normal(kw, (cout, cin, ksize), jnp.float32)
    gamma = 1.0 + 0.1 * jax.random.normal(kg, (cout,), jnp.float32)
    beta = 0.1 * jax.random.normal(kb, (cout,), jnp.float32)
    running_mean = 0.1 * jax.random.normal(km, (cout,), jnp.float32)
    running_var = 1.0 + 0.1 * jax.random.uniform(kv, (cout,), jnp.float32)
    scale = gamma / jnp.sqrt(running_var + BN_EPS)
    shift = beta - running_mean * scale
    center = ksize // 2                           # only tap that sees data at L=1
    w_mat = jnp.transpose(w[:, :, center]) * scale[None, :]   # BN scale folded in
    w_pad = jnp.zeros((cin_pad, cout_pad), jnp.float32).at[:cin, :cout].set(w_mat)
    shift_pad = jnp.zeros((cout_pad,), jnp.float32).at[:cout].set(shift)
    return w_pad, shift_pad


def init_resblock(key, cin, cout, stride, cin_pad, cout_pad):
    k1, k2, k3 = jax.random.split(key, 3)
    w1, s1 = init_conv_bn(k1, cin, cout, 3, cin_pad, cout_pad)
    w2, s2 = init_conv_bn(k2, cout, cout, 3, cout_pad, cout_pad)
    if stride != 1 or cin != cout:
        # concatenate shortcut 1x1 conv with conv1: one matmul feeds both paths
        wp, sp = init_conv_bn(k3, cin, cout, 1, cin_pad, cout_pad)
        w1 = jnp.concatenate([w1, wp], axis=1)
        s1 = jnp.concatenate([s1, sp], axis=0)
    return {"w1": w1.astype(jnp.bfloat16), "s1": s1.reshape(1, -1),
            "w2": w2.astype(jnp.bfloat16), "s2": s2.reshape(1, -1)}


def init_combined(key):
    kg_w, kg_b, k_rn = jax.random.split(key, 3)
    gcn_w = 0.1 * jax.random.normal(kg_w, (NUM_FEATURES, HIDDEN_DIM), jnp.float32)
    gcn_b = 0.01 * jax.random.normal(kg_b, (HIDDEN_DIM,), jnp.float32)
    gcn_w_pad = jnp.zeros((FEAT_PAD, HID_PAD), jnp.float32)
    gcn_w_pad = gcn_w_pad.at[:NUM_FEATURES, :HIDDEN_DIM].set(gcn_w)
    gcn_b_pad = jnp.zeros((HID_PAD,), jnp.float32).at[:HIDDEN_DIM].set(gcn_b)

    keys = jax.random.split(k_rn, 11)
    stem_w, stem_s = init_conv_bn(keys[0], HIDDEN_DIM, 256, 3, HID_PAD, STEM_OUT)

    blocks = []
    for bi, (cin, cout, stride) in enumerate(BLOCK_LAYOUT):
        cin_pad = 256 if bi == 0 else C_PAD
        blocks.append(init_resblock(keys[1 + bi], cin, cout, stride, cin_pad, C_PAD))

    # TODO(synk): original code declares nn.Linear(32, num_classes), which is
    # shape-inconsistent with the flattened [N, 64] features (would raise at
    # runtime in PyTorch); we use in_features=64 so the graph runs.
    fc_w = 0.05 * jax.random.normal(keys[9], (NUM_CLASSES, 64), jnp.float32)
    fc_b = 0.01 * jax.random.normal(keys[10], (NUM_CLASSES,), jnp.float32)
    fc_w_pad = jnp.zeros((C_PAD, CLS_PAD), jnp.float32)
    fc_w_pad = fc_w_pad.at[:64, :NUM_CLASSES].set(jnp.transpose(fc_w))
    fc_b_pad = jnp.zeros((CLS_PAD,), jnp.float32).at[:NUM_CLASSES].set(fc_b)

    return {
        "gcn_w": gcn_w_pad.astype(jnp.bfloat16),
        "gcn_b": gcn_b_pad.reshape(1, -1),
        "stem_w": stem_w.astype(jnp.bfloat16),
        "stem_s": stem_s.reshape(1, -1),
        "blocks": blocks,
        "fc_w": fc_w_pad.astype(jnp.bfloat16),
        "fc_b": fc_b_pad.reshape(1, -1),
    }


# ---------------------------------------------------------------------------
# Jitted forward: tiny adjacency normalization in XLA + one fused Pallas call
# ---------------------------------------------------------------------------
@jax.jit
def combined_net_forward(params, edge_index, x):
    n = x.shape[0]

    # GCN symmetric normalization with self-loops (tiny [N,N]; N=8 here).
    # NOTE: if N ever scales to thousands, this dense [N,N] path (and its
    # full-array BlockSpec) must be tiled / made sparse first.
    src, dst = edge_index[0], edge_index[1]
    adj = jnp.zeros((n, n), jnp.float32).at[dst, src].set(1.0)
    adj = jnp.maximum(adj, jnp.eye(n, dtype=jnp.float32))   # self-loops
    deg = adj.sum(axis=1)
    dinv = jax.lax.rsqrt(deg)
    a_norm = (dinv[:, None] * adj * dinv[None, :]).astype(jnp.bfloat16)

    x_pad = jnp.zeros((n, FEAT_PAD), jnp.bfloat16)
    x_pad = x_pad.at[:, :NUM_FEATURES].set(x.astype(jnp.bfloat16))

    flat_inputs = [a_norm, x_pad,
                   params["gcn_w"], params["gcn_b"],
                   params["stem_w"], params["stem_s"]]
    for b in params["blocks"]:
        flat_inputs += [b["w1"], b["s1"], b["w2"], b["s2"]]
    flat_inputs += [params["fc_w"], params["fc_b"]]

    in_specs = [pl.BlockSpec(t.shape, lambda i: (0, 0)) for t in flat_inputs]

    out_pad = pl.pallas_call(
        _FUSED_KERNEL,
        out_shape=jax.ShapeDtypeStruct((n, CLS_PAD), jnp.float32),
        grid=(1,),
        in_specs=in_specs,
        out_specs=pl.BlockSpec((n, CLS_PAD), lambda i: (0, 0)),
        compiler_params=pltpu.CompilerParams(
            dimension_semantics=("arbitrary",)),
    )(*flat_inputs)

    return out_pad[:, :NUM_CLASSES]


if __name__ == "__main__":
    key = jax.random.PRNGKey(0)
    k_params, k_src, k_dst, k_x = jax.random.split(key, 4)

    N_NODES, N_EDGES = 8, 16
    src = jax.random.randint(k_src, (N_EDGES,), 0, N_NODES)
    dst = jax.random.randint(k_dst, (N_EDGES,), 0, N_NODES)
    edge_index = jnp.stack([src, dst])                               # [2, E]
    node_feats = jax.random.normal(k_x, (N_NODES, NUM_FEATURES), jnp.float32)

    params = init_combined(k_params)

    out = combined_net_forward(params, edge_index, node_feats)
    out = jax.block_until_ready(out)
    assert out.shape == (N_NODES, NUM_CLASSES)
    assert bool(jnp.all(jnp.isfinite(out)))
    print("KERNEL_OK")
</pallas_src>

<mosaic_0001>
module attributes {stable_mosaic.version = 11 : i64} {
  func.func @kernel(%arg0: i32, %arg1: memref<8x8xbf16, #tpu.memory_space<vmem>>, %arg2: memref<8x128xbf16, #tpu.memory_space<vmem>>, %arg3: memref<128x384xbf16, #tpu.memory_space<vmem>>, %arg4: memref<1x384xf32, #tpu.memory_space<vmem>>, %arg5: memref<384x256xbf16, #tpu.memory_space<vmem>>, %arg6: memref<1x256xf32, #tpu.memory_space<vmem>>, %arg7: memref<256x256xbf16, #tpu.memory_space<vmem>>, %arg8: memref<1x256xf32, #tpu.memory_space<vmem>>, %arg9: memref<128x128xbf16, #tpu.memory_space<vmem>>, %arg10: memref<1x128xf32, #tpu.memory_space<vmem>>, %arg11: memref<128x128xbf16, #tpu.memory_space<vmem>>, %arg12: memref<1x128xf32, #tpu.memory_space<vmem>>, %arg13: memref<128x128xbf16, #tpu.memory_space<vmem>>, %arg14: memref<1x128xf32, #tpu.memory_space<vmem>>, %arg15: memref<128x256xbf16, #tpu.memory_space<vmem>>, %arg16: memref<1x256xf32, #tpu.memory_space<vmem>>, %arg17: memref<128x128xbf16, #tpu.memory_space<vmem>>, %arg18: memref<1x128xf32, #tpu.memory_space<vmem>>, %arg19: memref<128x128xbf16, #tpu.memory_space<vmem>>, %arg20: memref<1x128xf32, #tpu.memory_space<vmem>>, %arg21: memref<128x128xbf16, #tpu.memory_space<vmem>>, %arg22: memref<1x128xf32, #tpu.memory_space<vmem>>, %arg23: memref<128x256xbf16, #tpu.memory_space<vmem>>, %arg24: memref<1x256xf32, #tpu.memory_space<vmem>>, %arg25: memref<128x128xbf16, #tpu.memory_space<vmem>>, %arg26: memref<1x128xf32, #tpu.memory_space<vmem>>, %arg27: memref<128x128xbf16, #tpu.memory_space<vmem>>, %arg28: memref<1x128xf32, #tpu.memory_space<vmem>>, %arg29: memref<128x128xbf16, #tpu.memory_space<vmem>>, %arg30: memref<1x128xf32, #tpu.memory_space<vmem>>, %arg31: memref<128x256xbf16, #tpu.memory_space<vmem>>, %arg32: memref<1x256xf32, #tpu.memory_space<vmem>>, %arg33: memref<128x128xbf16, #tpu.memory_space<vmem>>, %arg34: memref<1x128xf32, #tpu.memory_space<vmem>>, %arg35: memref<128x128xbf16, #tpu.memory_space<vmem>>, %arg36: memref<1x128xf32, #tpu.memory_space<vmem>>, %arg37: memref<128x128xbf16, #tpu.memory_space<vmem>>, %arg38: memref<1x128xf32, #tpu.memory_space<vmem>>, %arg39: memref<128x128xbf16, #tpu.memory_space<vmem>>, %arg40: memref<1x128xf32, #tpu.memory_space<vmem>>, %arg41: memref<8x128xf32, #tpu.memory_space<vmem>>) attributes {dimension_semantics = [#tpu.dimension_semantics<arbitrary>], iteration_bounds = array<i64: 1>, scalar_prefetch = 0 : i64, scratch_operands = 0 : i64, tpu.core_type = #tpu.core_type<tc>, window_params = [{pipeline_mode = #tpu.pipeline_mode<synchronous>, transform_indices = @transform_0, window_bounds = array<i64: 8, 8>}, {pipeline_mode = #tpu.pipeline_mode<synchronous>, transform_indices = @transform_1, window_bounds = array<i64: 8, 128>}, {pipeline_mode = #tpu.pipeline_mode<synchronous>, transform_indices = @transform_2, window_bounds = array<i64: 128, 384>}, {pipeline_mode = #tpu.pipeline_mode<synchronous>, transform_indices = @transform_3, window_bounds = array<i64: 1, 384>}, {pipeline_mode = #tpu.pipeline_mode<synchronous>, transform_indices = @transform_4, window_bounds = array<i64: 384, 256>}, {pipeline_mode = #tpu.pipeline_mode<synchronous>, transform_indices = @transform_5, window_bounds = array<i64: 1, 256>}, {pipeline_mode = #tpu.pipeline_mode<synchronous>, transform_indices = @transform_6, window_bounds = array<i64: 256, 256>}, {pipeline_mode = #tpu.pipeline_mode<synchronous>, transform_indices = @transform_7, window_bounds = array<i64: 1, 256>}, {pipeline_mode = #tpu.pipeline_mode<synchronous>, transform_indices = @transform_8, window_bounds = array<i64: 128, 128>}, {pipeline_mode = #tpu.pipeline_mode<synchronous>, transform_indices = @transform_9, window_bounds = array<i64: 1, 128>}, {pipeline_mode = #tpu.pipeline_mode<synchronous>, transform_indices = @transform_10, window_bounds = array<i64: 128, 128>}, {pipeline_mode = #tpu.pipeline_mode<synchronous>, transform_indices = @transform_11, window_bounds = array<i64: 1, 128>}, {pipeline_mode = #tpu.pipeline_mode<synchronous>, transform_indices = @transform_12, window_bounds = array<i64: 128, 128>}, {pipeline_mode = #tpu.pipeline_mode<synchronous>, transform_indices = @transform_13, window_bounds = array<i64: 1, 128>}, {pipeline_mode = #tpu.pipeline_mode<synchronous>, transform_indices = @transform_14, window_bounds = array<i64: 128, 256>}, {pipeline_mode = #tpu.pipeline_mode<synchronous>, transform_indices = @transform_15, window_bounds = array<i64: 1, 256>}, {pipeline_mode = #tpu.pipeline_mode<synchronous>, transform_indices = @transform_16, window_bounds = array<i64: 128, 128>}, {pipeline_mode = #tpu.pipeline_mode<synchronous>, transform_indices = @transform_17, window_bounds = array<i64: 1, 128>}, {pipeline_mode = #tpu.pipeline_mode<synchronous>, transform_indices = @transform_18, window_bounds = array<i64: 128, 128>}, {pipeline_mode = #tpu.pipeline_mode<synchronous>, transform_indices = @transform_19, window_bounds = array<i64: 1, 128>}, {pipeline_mode = #tpu.pipeline_mode<synchronous>, transform_indices = @transform_20, window_bounds = array<i64: 128, 128>}, {pipeline_mode = #tpu.pipeline_mode<synchronous>, transform_indices = @transform_21, window_bounds = array<i64: 1, 128>}, {pipeline_mode = #tpu.pipeline_mode<synchronous>, transform_indices = @transform_22, window_bounds = array<i64: 128, 256>}, {pipeline_mode = #tpu.pipeline_mode<synchronous>, transform_indices = @transform_23, window_bounds = array<i64: 1, 256>}, {pipeline_mode = #tpu.pipeline_mode<synchronous>, transform_indices = @transform_24, window_bounds = array<i64: 128, 128>}, {pipeline_mode = #tpu.pipeline_mode<synchronous>, transform_indices = @transform_25, window_bounds = array<i64: 1, 128>}, {pipeline_mode = #tpu.pipeline_mode<synchronous>, transform_indices = @transform_26, window_bounds = array<i64: 128, 128>}, {pipeline_mode = #tpu.pipeline_mode<synchronous>, transform_indices = @transform_27, window_bounds = array<i64: 1, 128>}, {pipeline_mode = #tpu.pipeline_mode<synchronous>, transform_indices = @transform_28, window_bounds = array<i64: 128, 128>}, {pipeline_mode = #tpu.pipeline_mode<synchronous>, transform_indices = @transform_29, window_bounds = array<i64: 1, 128>}, {pipeline_mode = #tpu.pipeline_mode<synchronous>, transform_indices = @transform_30, window_bounds = array<i64: 128, 256>}, {pipeline_mode = #tpu.pipeline_mode<synchronous>, transform_indices = @transform_31, window_bounds = array<i64: 1, 256>}, {pipeline_mode = #tpu.pipeline_mode<synchronous>, transform_indices = @transform_32, window_bounds = array<i64: 128, 128>}, {pipeline_mode = #tpu.pipeline_mode<synchronous>, transform_indices = @transform_33, window_bounds = array<i64: 1, 128>}, {pipeline_mode = #tpu.pipeline_mode<synchronous>, transform_indices = @transform_34, window_bounds = array<i64: 128, 128>}, {pipeline_mode = #tpu.pipeline_mode<synchronous>, transform_indices = @transform_35, window_bounds = array<i64: 1, 128>}, {pipeline_mode = #tpu.pipeline_mode<synchronous>, transform_indices = @transform_36, window_bounds = array<i64: 128, 128>}, {pipeline_mode = #tpu.pipeline_mode<synchronous>, transform_indices = @transform_37, window_bounds = array<i64: 1, 128>}, {pipeline_mode = #tpu.pipeline_mode<synchronous>, transform_indices = @transform_38, window_bounds = array<i64: 128, 128>}, {pipeline_mode = #tpu.pipeline_mode<synchronous>, transform_indices = @transform_39, window_bounds = array<i64: 1, 128>}, {pipeline_mode = #tpu.pipeline_mode<synchronous>, transform_indices = @transform_40, window_bounds = array<i64: 8, 128>}]} {
    %c0 = arith.constant 0 : index
    %c0_0 = arith.constant 0 : index
    %0 = vector.load %arg2[%c0, %c0_0] : memref<8x128xbf16, #tpu.memory_space<vmem>>, vector<8x128xbf16>
    %c0_1 = arith.constant 0 : index
    %c0_2 = arith.constant 0 : index
    %1 = vector.load %arg3[%c0_1, %c0_2] : memref<128x384xbf16, #tpu.memory_space<vmem>>, vector<128x384xbf16>
    %cst = arith.constant dense<0.000000e+00> : vector<8x384xf32>
    %2 = tpu.matmul %0, %1, %cst {dimension_numbers = #tpu.dot_dimension_numbers<[1], [0], [0], [1], [0, 0, 1, 1], [], []>} : vector<8x128xbf16>, vector<128x384xbf16>, vector<8x384xf32> -> vector<8x384xf32>
    %c0_3 = arith.constant 0 : index
    %c0_4 = arith.constant 0 : index
    %3 = vector.load %arg1[%c0_3, %c0_4] : memref<8x8xbf16, #tpu.memory_space<vmem>>, vector<8x8xbf16>
    %4 = arith.truncf %2 : vector<8x384xf32> to vector<8x384xbf16>
    %cst_5 = arith.constant dense<0.000000e+00> : vector<8x384xf32>
    %5 = tpu.matmul %3, %4, %cst_5 {dimension_numbers = #tpu.dot_dimension_numbers<[1], [0], [0], [1], [0, 0, 1, 1], [], []>} : vector<8x8xbf16>, vector<8x384xbf16>, vector<8x384xf32> -> vector<8x384xf32>
    %c0_6 = arith.constant 0 : index
    %c0_7 = arith.constant 0 : index
    %6 = vector.load %arg4[%c0_6, %c0_7] : memref<1x384xf32, #tpu.memory_space<vmem>>, vector<1x384xf32>
    %7 = vector.broadcast %6 : vector<1x384xf32> to vector<8x384xf32>
    %8 = arith.addf %5, %7 : vector<8x384xf32>
    %cst_8 = arith.constant 0.000000e+00 : f32
    %9 = vector.broadcast %cst_8 : f32 to vector<8x384xf32>
    %10 = arith.maximumf %8, %9 : vector<8x384xf32>
    %11 = arith.truncf %10 : vector<8x384xf32> to vector<8x384xbf16>
    %c0_9 = arith.constant 0 : index
    %c0_10 = arith.constant 0 : index
    %12 = vector.load %arg5[%c0_9, %c0_10] : memref<384x256xbf16, #tpu.memory_space<vmem>>, vector<384x256xbf16>
    %cst_11 = arith.constant dense<0.000000e+00> : vector<8x256xf32>
    %13 = tpu.matmul %11, %12, %cst_11 {dimension_numbers = #tpu.dot_dimension_numbers<[1], [0], [0], [1], [0, 0, 1, 1], [], []>} : vector<8x384xbf16>, vector<384x256xbf16>, vector<8x256xf32> -> vector<8x256xf32>
    %c0_12 = arith.constant 0 : index
    %c0_13 = arith.constant 0 : index
    %14 = vector.load %arg6[%c0_12, %c0_13] : memref<1x256xf32, #tpu.memory_space<vmem>>, vector<1x256xf32>
    %15 = vector.broadcast %14 : vector<1x256xf32> to vector<8x256xf32>
    %16 = arith.addf %13, %15 : vector<8x256xf32>
    %cst_14 = arith.constant 0.000000e+00 : f32
    %17 = vector.broadcast %cst_14 : f32 to vector<8x256xf32>
    %18 = arith.maximumf %16, %17 : vector<8x256xf32>
    %19 = arith.truncf %18 : vector<8x256xf32> to vector<8x256xbf16>
    %c0_15 = arith.constant 0 : index
    %c0_16 = arith.constant 0 : index
    %20 = vector.load %arg7[%c0_15, %c0_16] : memref<256x256xbf16, #tpu.memory_space<vmem>>, vector<256x256xbf16>
    %cst_17 = arith.constant dense<0.000000e+00> : vector<8x256xf32>
    %21 = tpu.matmul %19, %20, %cst_17 {dimension_numbers = #tpu.dot_dimension_numbers<[1], [0], [0], [1], [0, 0, 1, 1], [], []>} : vector<8x256xbf16>, vector<256x256xbf16>, vector<8x256xf32> -> vector<8x256xf32>
    %c0_18 = arith.constant 0 : index
    %c0_19 = arith.constant 0 : index
    %22 = vector.load %arg8[%c0_18, %c0_19] : memref<1x256xf32, #tpu.memory_space<vmem>>, vector<1x256xf32>
    %23 = vector.broadcast %22 : vector<1x256xf32> to vector<8x256xf32>
    %24 = arith.addf %21, %23 : vector<8x256xf32>
    %25 = vector.extract_strided_slice %24 {offsets = [0, 0], sizes = [8, 128], strides = [1, 1]} : vector<8x256xf32> to vector<8x128xf32>
    %cst_20 = arith.constant 0.000000e+00 : f32
    %26 = vector.broadcast %cst_20 : f32 to vector<8x128xf32>
    %27 = arith.maximumf %25, %26 : vector<8x128xf32>
    %28 = vector.extract_strided_slice %24 {offsets = [0, 128], sizes = [8, 128], strides = [1, 1]} : vector<8x256xf32> to vector<8x128xf32>
    %29 = arith.truncf %27 : vector<8x128xf32> to vector<8x128xbf16>
    %c0_21 = arith.constant 0 : index
    %c0_22 = arith.constant 0 : index
    %30 = vector.load %arg9[%c0_21, %c0_22] : memref<128x128xbf16, #tpu.memory_space<vmem>>, vector<128x128xbf16>
    %cst_23 = arith.constant dense<0.000000e+00> : vector<8x128xf32>
    %31 = tpu.matmul %29, %30, %cst_23 {dimension_numbers = #tpu.dot_dimension_numbers<[1], [0], [0], [1], [0, 0, 1, 1], [], []>} : vector<8x128xbf16>, vector<128x128xbf16>, vector<8x128xf32> -> vector<8x128xf32>
    %c0_24 = arith.constant 0 : index
    %c0_25 = arith.constant 0 : index
    %32 = vector.load %arg10[%c0_24, %c0_25] : memref<1x128xf32, #tpu.memory_space<vmem>>, vector<1x128xf32>
    %33 = vector.broadcast %32 : vector<1x128xf32> to vector<8x128xf32>
    %34 = arith.addf %31, %33 : vector<8x128xf32>
    %cst_26 = arith.constant 0.000000e+00 : f32
    %35 = vector.broadcast %cst_26 : f32 to vector<8x128xf32>
    %36 = arith.maximumf %34, %35 : vector<8x128xf32>
    %37 = arith.addf %36, %28 : vector<8x128xf32>
    %cst_27 = arith.constant 0.000000e+00 : f32
    %38 = vector.broadcast %cst_27 : f32 to vector<8x128xf32>
    %39 = arith.maximumf %37, %38 : vector<8x128xf32>
    %40 = arith.truncf %39 : vector<8x128xf32> to vector<8x128xbf16>
    %c0_28 = arith.constant 0 : index
    %c0_29 = arith.constant 0 : index
    %41 = vector.load %arg11[%c0_28, %c0_29] : memref<128x128xbf16, #tpu.memory_space<vmem>>, vector<128x128xbf16>
    %cst_30 = arith.constant dense<0.000000e+00> : vector<8x128xf32>
    %42 = tpu.matmul %40, %41, %cst_30 {dimension_numbers = #tpu.dot_dimension_numbers<[1], [0], [0], [1], [0, 0, 1, 1], [], []>} : vector<8x128xbf16>, vector<128x128xbf16>, vector<8x128xf32> -> vector<8x128xf32>
    %c0_31 = arith.constant 0 : index
    %c0_32 = arith.constant 0 : index
    %43 = vector.load %arg12[%c0_31, %c0_32] : memref<1x128xf32, #tpu.memory_space<vmem>>, vector<1x128xf32>
    %44 = vector.broadcast %43 : vector<1x128xf32> to vector<8x128xf32>
    %45 = arith.addf %42, %44 : vector<8x128xf32>
    %cst_33 = arith.constant 0.000000e+00 : f32
    %46 = vector.broadcast %cst_33 : f32 to vector<8x128xf32>
    %47 = arith.maximumf %45, %46 : vector<8x128xf32>
    %48 = arith.truncf %47 : vector<8x128xf32> to vector<8x128xbf16>
    %c0_34 = arith.constant 0 : index
    %c0_35 = arith.constant 0 : index
    %49 = vector.load %arg13[%c0_34, %c0_35] : memref<128x128xbf16, #tpu.memory_space<vmem>>, vector<128x128xbf16>
    %cst_36 = arith.constant dense<0.000000e+00> : vector<8x128xf32>
    %50 = tpu.matmul %48, %49, %cst_36 {dimension_numbers = #tpu.dot_dimension_numbers<[1], [0], [0], [1], [0, 0, 1, 1], [], []>} : vector<8x128xbf16>, vector<128x128xbf16>, vector<8x128xf32> -> vector<8x128xf32>
    %c0_37 = arith.constant 0 : index
    %c0_38 = arith.constant 0 : index
    %51 = vector.load %arg14[%c0_37, %c0_38] : memref<1x128xf32, #tpu.memory_space<vmem>>, vector<1x128xf32>
    %52 = vector.broadcast %51 : vector<1x128xf32> to vector<8x128xf32>
    %53 = arith.addf %50, %52 : vector<8x128xf32>
    %cst_39 = arith.constant 0.000000e+00 : f32
    %54 = vector.broadcast %cst_39 : f32 to vector<8x128xf32>
    %55 = arith.maximumf %53, %54 : vector<8x128xf32>
    %56 = arith.addf %55, %39 : vector<8x128xf32>
    %cst_40 = arith.constant 0.000000e+00 : f32
    %57 = vector.broadcast %cst_40 : f32 to vector<8x128xf32>
    %58 = arith.maximumf %56, %57 : vector<8x128xf32>
    %59 = arith.truncf %58 : vector<8x128xf32> to vector<8x128xbf16>
    %c0_41 = arith.constant 0 : index
    %c0_42 = arith.constant 0 : index
    %60 = vector.load %arg15[%c0_41, %c0_42] : memref<128x256xbf16, #tpu.memory_space<vmem>>, vector<128x256xbf16>
    %cst_43 = arith.constant dense<0.000000e+00> : vector<8x256xf32>
    %61 = tpu.matmul %59, %60, %cst_43 {dimension_numbers = #tpu.dot_dimension_numbers<[1], [0], [0], [1], [0, 0, 1, 1], [], []>} : vector<8x128xbf16>, vector<128x256xbf16>, vector<8x256xf32> -> vector<8x256xf32>
    %c0_44 = arith.constant 0 : index
    %c0_45 = arith.constant 0 : index
    %62 = vector.load %arg16[%c0_44, %c0_45] : memref<1x256xf32, #tpu.memory_space<vmem>>, vector<1x256xf32>
    %63 = vector.broadcast %62 : vector<1x256xf32> to vector<8x256xf32>
    %64 = arith.addf %61, %63 : vector<8x256xf32>
    %65 = vector.extract_strided_slice %64 {offsets = [0, 0], sizes = [8, 128], strides = [1, 1]} : vector<8x256xf32> to vector<8x128xf32>
    %cst_46 = arith.constant 0.000000e+00 : f32
    %66 = vector.broadcast %cst_46 : f32 to vector<8x128xf32>
    %67 = arith.maximumf %65, %66 : vector<8x128xf32>
    %68 = vector.extract_strided_slice %64 {offsets = [0, 128], sizes = [8, 128], strides = [1, 1]} : vector<8x256xf32> to vector<8x128xf32>
    %69 = arith.truncf %67 : vector<8x128xf32> to vector<8x128xbf16>
    %c0_47 = arith.constant 0 : index
    %c0_48 = arith.constant 0 : index
    %70 = vector.load %arg17[%c0_47, %c0_48] : memref<128x128xbf16, #tpu.memory_space<vmem>>, vector<128x128xbf16>
    %cst_49 = arith.constant dense<0.000000e+00> : vector<8x128xf32>
    %71 = tpu.matmul %69, %70, %cst_49 {dimension_numbers = #tpu.dot_dimension_numbers<[1], [0], [0], [1], [0, 0, 1, 1], [], []>} : vector<8x128xbf16>, vector<128x128xbf16>, vector<8x128xf32> -> vector<8x128xf32>
    %c0_50 = arith.constant 0 : index
    %c0_51 = arith.constant 0 : index
    %72 = vector.load %arg18[%c0_50, %c0_51] : memref<1x128xf32, #tpu.memory_space<vmem>>, vector<1x128xf32>
    %73 = vector.broadcast %72 : vector<1x128xf32> to vector<8x128xf32>
    %74 = arith.addf %71, %73 : vector<8x128xf32>
    %cst_52 = arith.constant 0.000000e+00 : f32
    %75 = vector.broadcast %cst_52 : f32 to vector<8x128xf32>
    %76 = arith.maximumf %74, %75 : vector<8x128xf32>
    %77 = arith.addf %76, %68 : vector<8x128xf32>
    %cst_53 = arith.constant 0.000000e+00 : f32
    %78 = vector.broadcast %cst_53 : f32 to vector<8x128xf32>
    %79 = arith.maximumf %77, %78 : vector<8x128xf32>
    %80 = arith.truncf %79 : vector<8x128xf32> to vector<8x128xbf16>
    %c0_54 = arith.constant 0 : index
    %c0_55 = arith.constant 0 : index
    %81 = vector.load %arg19[%c0_54, %c0_55] : memref<128x128xbf16, #tpu.memory_space<vmem>>, vector<128x128xbf16>
    %cst_56 = arith.constant dense<0.000000e+00> : vector<8x128xf32>
    %82 = tpu.matmul %80, %81, %cst_56 {dimension_numbers = #tpu.dot_dimension_numbers<[1], [0], [0], [1], [0, 0, 1, 1], [], []>} : vector<8x128xbf16>, vector<128x128xbf16>, vector<8x128xf32> -> vector<8x128xf32>
    %c0_57 = arith.constant 0 : index
    %c0_58 = arith.constant 0 : index
    %83 = vector.load %arg20[%c0_57, %c0_58] : memref<1x128xf32, #tpu.memory_space<vmem>>, vector<1x128xf32>
    %84 = vector.broadcast %83 : vector<1x128xf32> to vector<8x128xf32>
    %85 = arith.addf %82, %84 : vector<8x128xf32>
    %cst_59 = arith.constant 0.000000e+00 : f32
    %86 = vector.broadcast %cst_59 : f32 to vector<8x128xf32>
    %87 = arith.maximumf %85, %86 : vector<8x128xf32>
    %88 = arith.truncf %87 : vector<8x128xf32> to vector<8x128xbf16>
    %c0_60 = arith.constant 0 : index
    %c0_61 = arith.constant 0 : index
    %89 = vector.load %arg21[%c0_60, %c0_61] : memref<128x128xbf16, #tpu.memory_space<vmem>>, vector<128x128xbf16>
    %cst_62 = arith.constant dense<0.000000e+00> : vector<8x128xf32>
    %90 = tpu.matmul %88, %89, %cst_62 {dimension_numbers = #tpu.dot_dimension_numbers<[1], [0], [0], [1], [0, 0, 1, 1], [], []>} : vector<8x128xbf16>, vector<128x128xbf16>, vector<8x128xf32> -> vector<8x128xf32>
    %c0_63 = arith.constant 0 : index
    %c0_64 = arith.constant 0 : index
    %91 = vector.load %arg22[%c0_63, %c0_64] : memref<1x128xf32, #tpu.memory_space<vmem>>, vector<1x128xf32>
    %92 = vector.broadcast %91 : vector<1x128xf32> to vector<8x128xf32>
    %93 = arith.addf %90, %92 : vector<8x128xf32>
    %cst_65 = arith.constant 0.000000e+00 : f32
    %94 = vector.broadcast %cst_65 : f32 to vector<8x128xf32>
    %95 = arith.maximumf %93, %94 : vector<8x128xf32>
    %96 = arith.addf %95, %79 : vector<8x128xf32>
    %cst_66 = arith.constant 0.000000e+00 : f32
    %97 = vector.broadcast %cst_66 : f32 to vector<8x128xf32>
    %98 = arith.maximumf %96, %97 : vector<8x128xf32>
    %99 = arith.truncf %98 : vector<8x128xf32> to vector<8x128xbf16>
    %c0_67 = arith.constant 0 : index
    %c0_68 = arith.constant 0 : index
    %100 = vector.load %arg23[%c0_67, %c0_68] : memref<128x256xbf16, #tpu.memory_space<vmem>>, vector<128x256xbf16>
    %cst_69 = arith.constant dense<0.000000e+00> : vector<8x256xf32>
    %101 = tpu.matmul %99, %100, %cst_69 {dimension_numbers = #tpu.dot_dimension_numbers<[1], [0], [0], [1], [0, 0, 1, 1], [], []>} : vector<8x128xbf16>, vector<128x256xbf16>, vector<8x256xf32> -> vector<8x256xf32>
    %c0_70 = arith.constant 0 : index
    %c0_71 = arith.constant 0 : index
    %102 = vector.load %arg24[%c0_70, %c0_71] : memref<1x256xf32, #tpu.memory_space<vmem>>, vector<1x256xf32>
    %103 = vector.broadcast %102 : vector<1x256xf32> to vector<8x256xf32>
    %104 = arith.addf %101, %103 : vector<8x256xf32>
    %105 = vector.extract_strided_slice %104 {offsets = [0, 0], sizes = [8, 128], strides = [1, 1]} : vector<8x256xf32> to vector<8x128xf32>
    %cst_72 = arith.constant 0.000000e+00 : f32
    %106 = vector.broadcast %cst_72 : f32 to vector<8x128xf32>
    %107 = arith.maximumf %105, %106 : vector<8x128xf32>
    %108 = vector.extract_strided_slice %104 {offsets = [0, 128], sizes = [8, 128], strides = [1, 1]} : vector<8x256xf32> to vector<8x128xf32>
    %109 = arith.truncf %107 : vector<8x128xf32> to vector<8x128xbf16>
    %c0_73 = arith.constant 0 : index
    %c0_74 = arith.constant 0 : index
    %110 = vector.load %arg25[%c0_73, %c0_74] : memref<128x128xbf16, #tpu.memory_space<vmem>>, vector<128x128xbf16>
    %cst_75 = arith.constant dense<0.000000e+00> : vector<8x128xf32>
    %111 = tpu.matmul %109, %110, %cst_75 {dimension_numbers = #tpu.dot_dimension_numbers<[1], [0], [0], [1], [0, 0, 1, 1], [], []>} : vector<8x128xbf16>, vector<128x128xbf16>, vector<8x128xf32> -> vector<8x128xf32>
    %c0_76 = arith.constant 0 : index
    %c0_77 = arith.constant 0 : index
    %112 = vector.load %arg26[%c0_76, %c0_77] : memref<1x128xf32, #tpu.memory_space<vmem>>, vector<1x128xf32>
    %113 = vector.broadcast %112 : vector<1x128xf32> to vector<8x128xf32>
    %114 = arith.addf %111, %113 : vector<8x128xf32>
    %cst_78 = arith.constant 0.000000e+00 : f32
    %115 = vector.broadcast %cst_78 : f32 to vector<8x128xf32>
    %116 = arith.maximumf %114, %115 : vector<8x128xf32>
    %117 = arith.addf %116, %108 : vector<8x128xf32>
    %cst_79 = arith.constant 0.000000e+00 : f32
    %118 = vector.broadcast %cst_79 : f32 to vector<8x128xf32>
    %119 = arith.maximumf %117, %118 : vector<8x128xf32>
    %120 = arith.truncf %119 : vector<8x128xf32> to vector<8x128xbf16>
    %c0_80 = arith.constant 0 : index
    %c0_81 = arith.constant 0 : index
    %121 = vector.load %arg27[%c0_80, %c0_81] : memref<128x128xbf16, #tpu.memory_space<vmem>>, vector<128x128xbf16>
    %cst_82 = arith.constant dense<0.000000e+00> : vector<8x128xf32>
    %122 = tpu.matmul %120, %121, %cst_82 {dimension_numbers = #tpu.dot_dimension_numbers<[1], [0], [0], [1], [0, 0, 1, 1], [], []>} : vector<8x128xbf16>, vector<128x128xbf16>, vector<8x128xf32> -> vector<8x128xf32>
    %c0_83 = arith.constant 0 : index
    %c0_84 = arith.constant 0 : index
    %123 = vector.load %arg28[%c0_83, %c0_84] : memref<1x128xf32, #tpu.memory_space<vmem>>, vector<1x128xf32>
    %124 = vector.broadcast %123 : vector<1x128xf32> to vector<8x128xf32>
    %125 = arith.addf %122, %124 : vector<8x128xf32>
    %cst_85 = arith.constant 0.000000e+00 : f32
    %126 = vector.broadcast %cst_85 : f32 to vector<8x128xf32>
    %127 = arith.maximumf %125, %126 : vector<8x128xf32>
    %128 = arith.truncf %127 : vector<8x128xf32> to vector<8x128xbf16>
    %c0_86 = arith.constant 0 : index
    %c0_87 = arith.constant 0 : index
    %129 = vector.load %arg29[%c0_86, %c0_87] : memref<128x128xbf16, #tpu.memory_space<vmem>>, vector<128x128xbf16>
    %cst_88 = arith.constant dense<0.000000e+00> : vector<8x128xf32>
    %130 = tpu.matmul %128, %129, %cst_88 {dimension_numbers = #tpu.dot_dimension_numbers<[1], [0], [0], [1], [0, 0, 1, 1], [], []>} : vector<8x128xbf16>, vector<128x128xbf16>, vector<8x128xf32> -> vector<8x128xf32>
    %c0_89 = arith.constant 0 : index
    %c0_90 = arith.constant 0 : index
    %131 = vector.load %arg30[%c0_89, %c0_90] : memref<1x128xf32, #tpu.memory_space<vmem>>, vector<1x128xf32>
    %132 = vector.broadcast %131 : vector<1x128xf32> to vector<8x128xf32>
    %133 = arith.addf %130, %132 : vector<8x128xf32>
    %cst_91 = arith.constant 0.000000e+00 : f32
    %134 = vector.broadcast %cst_91 : f32 to vector<8x128xf32>
    %135 = arith.maximumf %133, %134 : vector<8x128xf32>
    %136 = arith.addf %135, %119 : vector<8x128xf32>
    %cst_92 = arith.constant 0.000000e+00 : f32
    %137 = vector.broadcast %cst_92 : f32 to vector<8x128xf32>
    %138 = arith.maximumf %136, %137 : vector<8x128xf32>
    %139 = arith.truncf %138 : vector<8x128xf32> to vector<8x128xbf16>
    %c0_93 = arith.constant 0 : index
    %c0_94 = arith.constant 0 : index
    %140 = vector.load %arg31[%c0_93, %c0_94] : memref<128x256xbf16, #tpu.memory_space<vmem>>, vector<128x256xbf16>
    %cst_95 = arith.constant dense<0.000000e+00> : vector<8x256xf32>
    %141 = tpu.matmul %139, %140, %cst_95 {dimension_numbers = #tpu.dot_dimension_numbers<[1], [0], [0], [1], [0, 0, 1, 1], [], []>} : vector<8x128xbf16>, vector<128x256xbf16>, vector<8x256xf32> -> vector<8x256xf32>
    %c0_96 = arith.constant 0 : index
    %c0_97 = arith.constant 0 : index
    %142 = vector.load %arg32[%c0_96, %c0_97] : memref<1x256xf32, #tpu.memory_space<vmem>>, vector<1x256xf32>
    %143 = vector.broadcast %142 : vector<1x256xf32> to vector<8x256xf32>
    %144 = arith.addf %141, %143 : vector<8x256xf32>
    %145 = vector.extract_strided_slice %144 {offsets = [0, 0], sizes = [8, 128], strides = [1, 1]} : vector<8x256xf32> to vector<8x128xf32>
    %cst_98 = arith.constant 0.000000e+00 : f32
    %146 = vector.broadcast %cst_98 : f32 to vector<8x128xf32>
    %147 = arith.maximumf %145, %146 : vector<8x128xf32>
    %148 = vector.extract_strided_slice %144 {offsets = [0, 128], sizes = [8, 128], strides = [1, 1]} : vector<8x256xf32> to vector<8x128xf32>
    %149 = arith.truncf %147 : vector<8x128xf32> to vector<8x128xbf16>
    %c0_99 = arith.constant 0 : index
    %c0_100 = arith.constant 0 : index
    %150 = vector.load %arg33[%c0_99, %c0_100] : memref<128x128xbf16, #tpu.memory_space<vmem>>, vector<128x128xbf16>
    %cst_101 = arith.constant dense<0.000000e+00> : vector<8x128xf32>
    %151 = tpu.matmul %149, %150, %cst_101 {dimension_numbers = #tpu.dot_dimension_numbers<[1], [0], [0], [1], [0, 0, 1, 1], [], []>} : vector<8x128xbf16>, vector<128x128xbf16>, vector<8x128xf32> -> vector<8x128xf32>
    %c0_102 = arith.constant 0 : index
    %c0_103 = arith.constant 0 : index
    %152 = vector.load %arg34[%c0_102, %c0_103] : memref<1x128xf32, #tpu.memory_space<vmem>>, vector<1x128xf32>
    %153 = vector.broadcast %152 : vector<1x128xf32> to vector<8x128xf32>
    %154 = arith.addf %151, %153 : vector<8x128xf32>
    %cst_104 = arith.constant 0.000000e+00 : f32
    %155 = vector.broadcast %cst_104 : f32 to vector<8x128xf32>
    %156 = arith.maximumf %154, %155 : vector<8x128xf32>
    %157 = arith.addf %156, %148 : vector<8x128xf32>
    %cst_105 = arith.constant 0.000000e+00 : f32
    %158 = vector.broadcast %cst_105 : f32 to vector<8x128xf32>
    %159 = arith.maximumf %157, %158 : vector<8x128xf32>
    %160 = arith.truncf %159 : vector<8x128xf32> to vector<8x128xbf16>
    %c0_106 = arith.constant 0 : index
    %c0_107 = arith.constant 0 : index
    %161 = vector.load %arg35[%c0_106, %c0_107] : memref<128x128xbf16, #tpu.memory_space<vmem>>, vector<128x128xbf16>
    %cst_108 = arith.constant dense<0.000000e+00> : vector<8x128xf32>
    %162 = tpu.matmul %160, %161, %cst_108 {dimension_numbers = #tpu.dot_dimension_numbers<[1], [0], [0], [1], [0, 0, 1, 1], [], []>} : vector<8x128xbf16>, vector<128x128xbf16>, vector<8x128xf32> -> vector<8x128xf32>
    %c0_109 = arith.constant 0 : index
    %c0_110 = arith.constant 0 : index
    %163 = vector.load %arg36[%c0_109, %c0_110] : memref<1x128xf32, #tpu.memory_space<vmem>>, vector<1x128xf32>
    %164 = vector.broadcast %163 : vector<1x128xf32> to vector<8x128xf32>
    %165 = arith.addf %162, %164 : vector<8x128xf32>
    %cst_111 = arith.constant 0.000000e+00 : f32
    %166 = vector.broadcast %cst_111 : f32 to vector<8x128xf32>
    %167 = arith.maximumf %165, %166 : vector<8x128xf32>
    %168 = arith.truncf %167 : vector<8x128xf32> to vector<8x128xbf16>
    %c0_112 = arith.constant 0 : index
    %c0_113 = arith.constant 0 : index
    %169 = vector.load %arg37[%c0_112, %c0_113] : memref<128x128xbf16, #tpu.memory_space<vmem>>, vector<128x128xbf16>
    %cst_114 = arith.constant dense<0.000000e+00> : vector<8x128xf32>
    %170 = tpu.matmul %168, %169, %cst_114 {dimension_numbers = #tpu.dot_dimension_numbers<[1], [0], [0], [1], [0, 0, 1, 1], [], []>} : vector<8x128xbf16>, vector<128x128xbf16>, vector<8x128xf32> -> vector<8x128xf32>
    %c0_115 = arith.constant 0 : index
    %c0_116 = arith.constant 0 : index
    %171 = vector.load %arg38[%c0_115, %c0_116] : memref<1x128xf32, #tpu.memory_space<vmem>>, vector<1x128xf32>
    %172 = vector.broadcast %171 : vector<1x128xf32> to vector<8x128xf32>
    %173 = arith.addf %170, %172 : vector<8x128xf32>
    %cst_117 = arith.constant 0.000000e+00 : f32
    %174 = vector.broadcast %cst_117 : f32 to vector<8x128xf32>
    %175 = arith.maximumf %173, %174 : vector<8x128xf32>
    %176 = arith.addf %175, %159 : vector<8x128xf32>
    %cst_118 = arith.constant 0.000000e+00 : f32
    %177 = vector.broadcast %cst_118 : f32 to vector<8x128xf32>
    %178 = arith.maximumf %176, %177 : vector<8x128xf32>
    %179 = arith.truncf %178 : vector<8x128xf32> to vector<8x128xbf16>
    %c0_119 = arith.constant 0 : index
    %c0_120 = arith.constant 0 : index
    %180 = vector.load %arg39[%c0_119, %c0_120] : memref<128x128xbf16, #tpu.memory_space<vmem>>, vector<128x128xbf16>
    %cst_121 = arith.constant dense<0.000000e+00> : vector<8x128xf32>
    %181 = tpu.matmul %179, %180, %cst_121 {dimension_numbers = #tpu.dot_dimension_numbers<[1], [0], [0], [1], [0, 0, 1, 1], [], []>} : vector<8x128xbf16>, vector<128x128xbf16>, vector<8x128xf32> -> vector<8x128xf32>
    %c0_122 = arith.constant 0 : index
    %c0_123 = arith.constant 0 : index
    %182 = vector.load %arg40[%c0_122, %c0_123] : memref<1x128xf32, #tpu.memory_space<vmem>>, vector<1x128xf32>
    %183 = vector.broadcast %182 : vector<1x128xf32> to vector<8x128xf32>
    %184 = arith.addf %181, %183 : vector<8x128xf32>
    %c0_124 = arith.constant 0 : index
    %c0_125 = arith.constant 0 : index
    %185 = vector.load %arg41[%c0_124, %c0_125] : memref<8x128xf32, #tpu.memory_space<vmem>>, vector<8x128xf32>
    tpu.vector_store %arg41[%c0_124, %c0_125], %184 {strides = array<i32>} : memref<8x128xf32, #tpu.memory_space<vmem>>, vector<8x128xf32>,
    return
  }
  func.func @transform_0(%arg0: i32) -> (i32, i32) {
    %c0_i32 = arith.constant 0 : i32
    %c0_i32_0 = arith.constant 0 : i32
    %c0_i32_1 = arith.constant 0 : i32
    return %c0_i32, %c0_i32_0 : i32, i32
  }
  func.func @transform_1(%arg0: i32) -> (i32, i32) {
    %c0_i32 = arith.constant 0 : i32
    %c0_i32_0 = arith.constant 0 : i32
    %c0_i32_1 = arith.constant 0 : i32
    return %c0_i32, %c0_i32_0 : i32, i32
  }
  func.func @transform_2(%arg0: i32) -> (i32, i32) {
    %c0_i32 = arith.constant 0 : i32
    %c0_i32_0 = arith.constant 0 : i32
    %c0_i32_1 = arith.constant 0 : i32
    return %c0_i32, %c0_i32_0 : i32, i32
  }
  func.func @transform_3(%arg0: i32) -> (i32, i32) {
    %c0_i32 = arith.constant 0 : i32
    %c0_i32_0 = arith.constant 0 : i32
    %c0_i32_1 = arith.constant 0 : i32
    return %c0_i32, %c0_i32_0 : i32, i32
  }
  func.func @transform_4(%arg0: i32) -> (i32, i32) {
    %c0_i32 = arith.constant 0 : i32
    %c0_i32_0 = arith.constant 0 : i32
    %c0_i32_1 = arith.constant 0 : i32
    return %c0_i32, %c0_i32_0 : i32, i32
  }
  func.func @transform_5(%arg0: i32) -> (i32, i32) {
    %c0_i32 = arith.constant 0 : i32
    %c0_i32_0 = arith.constant 0 : i32
    %c0_i32_1 = arith.constant 0 : i32
    return %c0_i32, %c0_i32_0 : i32, i32
  }
  func.func @transform_6(%arg0: i32) -> (i32, i32) {
    %c0_i32 = arith.constant 0 : i32
    %c0_i32_0 = arith.constant 0 : i32
    %c0_i32_1 = arith.constant 0 : i32
    return %c0_i32, %c0_i32_0 : i32, i32
  }
  func.func @transform_7(%arg0: i32) -> (i32, i32) {
    %c0_i32 = arith.constant 0 : i32
    %c0_i32_0 = arith.constant 0 : i32
    %c0_i32_1 = arith.constant 0 : i32
    return %c0_i32, %c0_i32_0 : i32, i32
  }
  func.func @transform_8(%arg0: i32) -> (i32, i32) {
    %c0_i32 = arith.constant 0 : i32
    %c0_i32_0 = arith.constant 0 : i32
    %c0_i32_1 = arith.constant 0 : i32
    return %c0_i32, %c0_i32_0 : i32, i32
  }
  func.func @transform_9(%arg0: i32) -> (i32, i32) {
    %c0_i32 = arith.constant 0 : i32
    %c0_i32_0 = arith.constant 0 : i32
    %c0_i32_1 = arith.constant 0 : i32
    return %c0_i32, %c0_i32_0 : i32, i32
  }
  func.func @transform_10(%arg0: i32) -> (i32, i32) {
    %c0_i32 = arith.constant 0 : i32
    %c0_i32_0 = arith.constant 0 : i32
    %c0_i32_1 = arith.constant 0 : i32
    return %c0_i32, %c0_i32_0 : i32, i32
  }
  func.func @transform_11(%arg0: i32) -> (i32, i32) {
    %c0_i32 = arith.constant 0 : i32
    %c0_i32_0 = arith.constant 0 : i32
    %c0_i32_1 = arith.constant 0 : i32
    return %c0_i32, %c0_i32_0 : i32, i32
  }
  func.func @transform_12(%arg0: i32) -> (i32, i32) {
    %c0_i32 = arith.constant 0 : i32
    %c0_i32_0 = arith.constant 0 : i32
    %c0_i32_1 = arith.constant 0 : i32
    return %c0_i32, %c0_i32_0 : i32, i32
  }
  func.func @transform_13(%arg0: i32) -> (i32, i32) {
    %c0_i32 = arith.constant 0 : i32
    %c0_i32_0 = arith.constant 0 : i32
    %c0_i32_1 = arith.constant 0 : i32
    return %c0_i32, %c0_i32_0 : i32, i32
  }
  func.func @transform_14(%arg0: i32) -> (i32, i32) {
    %c0_i32 = arith.constant 0 : i32
    %c0_i32_0 = arith.constant 0 : i32
    %c0_i32_1 = arith.constant 0 : i32
    return %c0_i32, %c0_i32_0 : i32, i32
  }
  func.func @transform_15(%arg0: i32) -> (i32, i32) {
    %c0_i32 = arith.constant 0 : i32
    %c0_i32_0 = arith.constant 0 : i32
    %c0_i32_1 = arith.constant 0 : i32
    return %c0_i32, %c0_i32_0 : i32, i32
  }
  func.func @transform_16(%arg0: i32) -> (i32, i32) {
    %c0_i32 = arith.constant 0 : i32
    %c0_i32_0 = arith.constant 0 : i32
    %c0_i32_1 = arith.constant 0 : i32
    return %c0_i32, %c0_i32_0 : i32, i32
  }
  func.func @transform_17(%arg0: i32) -> (i32, i32) {
    %c0_i32 = arith.constant 0 : i32
    %c0_i32_0 = arith.constant 0 : i32
    %c0_i32_1 = arith.constant 0 : i32
    return %c0_i32, %c0_i32_0 : i32, i32
  }
  func.func @transform_18(%arg0: i32) -> (i32, i32) {
    %c0_i32 = arith.constant 0 : i32
    %c0_i32_0 = arith.constant 0 : i32
    %c0_i32_1 = arith.constant 0 : i32
    return %c0_i32, %c0_i32_0 : i32, i32
  }
  func.func @transform_19(%arg0: i32) -> (i32, i32) {
    %c0_i32 = arith.constant 0 : i32
    %c0_i32_0 = arith.constant 0 : i32
    %c0_i32_1 = arith.constant 0 : i32
    return %c0_i32, %c0_i32_0 : i32, i32
  }
  func.func @transform_20(%arg0: i32) -> (i32, i32) {
    %c0_i32 = arith.constant 0 : i32
    %c0_i32_0 = arith.constant 0 : i32
    %c0_i32_1 = arith.constant 0 : i32
    return %c0_i32, %c0_i32_0 : i32, i32
  }
  func.func @transform_21(%arg0: i32) -> (i32, i32) {
    %c0_i32 = arith.constant 0 : i32
    %c0_i32_0 = arith.constant 0 : i32
    %c0_i32_1 = arith.constant 0 : i32
    return %c0_i32, %c0_i32_0 : i32, i32
  }
  func.func @transform_22(%arg0: i32) -> (i32, i32) {
    %c0_i32 = arith.constant 0 : i32
    %c0_i32_0 = arith.constant 0 : i32
    %c0_i32_1 = arith.constant 0 : i32
    return %c0_i32, %c0_i32_0 : i32, i32
  }
  func.func @transform_23(%arg0: i32) -> (i32, i32) {
    %c0_i32 = arith.constant 0 : i32
    %c0_i32_0 = arith.constant 0 : i32
    %c0_i32_1 = arith.constant 0 : i32
    return %c0_i32, %c0_i32_0 : i32, i32
  }
  func.func @transform_24(%arg0: i32) -> (i32, i32) {
    %c0_i32 = arith.constant 0 : i32
    %c0_i32_0 = arith.constant 0 : i32
    %c0_i32_1 = arith.constant 0 : i32
    return %c0_i32, %c0_i32_0 : i32, i32
  }
  func.func @transform_25(%arg0: i32) -> (i32, i32) {
    %c0_i32 = arith.constant 0 : i32
    %c0_i32_0 = arith.constant 0 : i32
    %c0_i32_1 = arith.constant 0 : i32
    return %c0_i32, %c0_i32_0 : i32, i32
  }
  func.func @transform_26(%arg0: i32) -> (i32, i32) {
    %c0_i32 = arith.constant 0 : i32
    %c0_i32_0 = arith.constant 0 : i32
    %c0_i32_1 = arith.constant 0 : i32
    return %c0_i32, %c0_i32_0 : i32, i32
  }
  func.func @transform_27(%arg0: i32) -> (i32, i32) {
    %c0_i32 = arith.constant 0 : i32
    %c0_i32_0 = arith.constant 0 : i32
    %c0_i32_1 = arith.constant 0 : i32
    return %c0_i32, %c0_i32_0 : i32, i32
  }
  func.func @transform_28(%arg0: i32) -> (i32, i32) {
    %c0_i32 = arith.constant 0 : i32
    %c0_i32_0 = arith.constant 0 : i32
    %c0_i32_1 = arith.constant 0 : i32
    return %c0_i32, %c0_i32_0 : i32, i32
  }
  func.func @transform_29(%arg0: i32) -> (i32, i32) {
    %c0_i32 = arith.constant 0 : i32
    %c0_i32_0 = arith.constant 0 : i32
    %c0_i32_1 = arith.constant 0 : i32
    return %c0_i32, %c0_i32_0 : i32, i32
  }
  func.func @transform_30(%arg0: i32) -> (i32, i32) {
    %c0_i32 = arith.constant 0 : i32
    %c0_i32_0 = arith.constant 0 : i32
    %c0_i32_1 = arith.constant 0 : i32
    return %c0_i32, %c0_i32_0 : i32, i32
  }
  func.func @transform_31(%arg0: i32) -> (i32, i32) {
    %c0_i32 = arith.constant 0 : i32
    %c0_i32_0 = arith.constant 0 : i32
    %c0_i32_1 = arith.constant 0 : i32
    return %c0_i32, %c0_i32_0 : i32, i32
  }
  func.func @transform_32(%arg0: i32) -> (i32, i32) {
    %c0_i32 = arith.constant 0 : i32
    %c0_i32_0 = arith.constant 0 : i32
    %c0_i32_1 = arith.constant 0 : i32
    return %c0_i32, %c0_i32_0 : i32, i32
  }
  func.func @transform_33(%arg0: i32) -> (i32, i32) {
    %c0_i32 = arith.constant 0 : i32
    %c0_i32_0 = arith.constant 0 : i32
    %c0_i32_1 = arith.constant 0 : i32
    return %c0_i32, %c0_i32_0 : i32, i32
  }
  func.func @transform_34(%arg0: i32) -> (i32, i32) {
    %c0_i32 = arith.constant 0 : i32
    %c0_i32_0 = arith.constant 0 : i32
    %c0_i32_1 = arith.constant 0 : i32
    return %c0_i32, %c0_i32_0 : i32, i32
  }
  func.func @transform_35(%arg0: i32) -> (i32, i32) {
    %c0_i32 = arith.constant 0 : i32
    %c0_i32_0 = arith.constant 0 : i32
    %c0_i32_1 = arith.constant 0 : i32
    return %c0_i32, %c0_i32_0 : i32, i32
  }
  func.func @transform_36(%arg0: i32) -> (i32, i32) {
    %c0_i32 = arith.constant 0 : i32
    %c0_i32_0 = arith.constant 0 : i32
    %c0_i32_1 = arith.constant 0 : i32
    return %c0_i32, %c0_i32_0 : i32, i32
  }
  func.func @transform_37(%arg0: i32) -> (i32, i32) {
    %c0_i32 = arith.constant 0 : i32
    %c0_i32_0 = arith.constant 0 : i32
    %c0_i32_1 = arith.constant 0 : i32
    return %c0_i32, %c0_i32_0 : i32, i32
  }
  func.func @transform_38(%arg0: i32) -> (i32, i32) {
    %c0_i32 = arith.constant 0 : i32
    %c0_i32_0 = arith.constant 0 : i32
    %c0_i32_1 = arith.constant 0 : i32
    return %c0_i32, %c0_i32_0 : i32, i32
  }
  func.func @transform_39(%arg0: i32) -> (i32, i32) {
    %c0_i32 = arith.constant 0 : i32
    %c0_i32_0 = arith.constant 0 : i32
    %c0_i32_1 = arith.constant 0 : i32
    return %c0_i32, %c0_i32_0 : i32, i32
  }
  func.func @transform_40(%arg0: i32) -> (i32, i32) {
    %c0_i32 = arith.constant 0 : i32
    %c0_i32_0 = arith.constant 0 : i32
    %c0_i32_1 = arith.constant 0 : i32
    return %c0_i32, %c0_i32_0 : i32, i32
  }
}

</mosaic_0001>

<bundles_post_ra>
// kernel: combined_net_forward.1
= control target key start
LH: loop header
LB: loop body
LE: loop exit
PB: predicated region body
PF: predicated region fallthrough
CT: control target
= control target key end

     0   :  { %s4244_s6 = smov 1   ;;  %s4245_s10 = smov 2   ;;  %s4962_s0 = inlined_call_operand.smem [shape: u32[41], index: -1, kind: input, shape index: {}] }
   0x1   :  { %s4296_s5 = sld [smem:[%s4962_s0]]   ;;  %s4246_s14 = smov 3  }
   0x2   :  { %s4301_s9 = sld [smem:[%s4962_s0 + %s4244_s6]]   ;;  %s4247_s18 = smov 4  }
   0x3   :  { %s4306_s13 = sld [smem:[%s4962_s0 + %s4245_s10]]   ;;  %s4248_s22 = smov 5  }
   0x4   :  { %s4311_s17 = sld [smem:[%s4962_s0 + %s4246_s14]]   ;;  %s4249_s26 = smov 6  }
   0x5   :  { %s4316_s21 = sld [smem:[%s4962_s0 + %s4247_s18]]   ;;  %s4250_s30 = smov 7  }
   0x6   :  { %s4321_s25 = sld [smem:[%s4962_s0 + %s4248_s22]]   ;;  %s4251_s4 = smov 8  }
   0x7   :  { %s4326_s29 = sld [smem:[%s4962_s0 + %s4249_s26]]   ;;  %s4252_s10 = smov 9  }
   0x8   :  { %s4331_s3 = sld [smem:[%s4962_s0 + %s4250_s30]]   ;;  %s4253_s15 = smov 10  }
   0x9   :  { %s4336_s8 = sld [smem:[%s4962_s0 + %s4251_s4]]   ;;  %s4254_s20 = smov 11  }
   0xa   :  { %s4341_s14 = sld [smem:[%s4962_s0 + %s4252_s10]]   ;;  %s4255_s26 = smov 12  }
   0xb   :  { %s4346_s19 = sld [smem:[%s4962_s0 + %s4253_s15]]   ;;  %s4256_s1 = smov 13  }
   0xc   :  { %s4351_s24 = sld [smem:[%s4962_s0 + %s4254_s20]]   ;;  %s4257_s7 = smov 14  }
   0xd   :  { %s4356_s30 = sld [smem:[%s4962_s0 + %s4255_s26]]   ;;  %s4258_s15 = smov 15  }
   0xe   :  { %s4361_s6 = sld [smem:[%s4962_s0 + %s4256_s1]]   ;;  %s4259_s22 = smov 16  }
   0xf   :  { %s4366_s12 = sld [smem:[%s4962_s0 + %s4257_s7]]   ;;  %s4260_s28 = smov 17  }
  0x10   :  { %s4371_s20 = sld [smem:[%s4962_s0 + %s4258_s15]]   ;;  %s4261_s7 = smov 18  }
  0x11   :  { %s4376_s27 = sld [smem:[%s4962_s0 + %s4259_s22]]   ;;  %s4262_s15 = smov 19  }
  0x12   :  { %s4381_s4 = sld [smem:[%s4962_s0 + %s4260_s28]]   ;;  %s4263_s22 = smov 20  }
  0x13   :  { %s4264_s28 = smov 21  }
  0x14   :  { %4974 = sst [smem:[#allocation5_spill]] %s4361_s6 }
  0x15   :  { %s4386_s6 = sld [smem:[%s4962_s0 + %s4261_s7]]   ;;  %s4265_s7 = smov 22  }
  0x16   :  { %4975 = sst [smem:[#allocation6_spill]] %s4371_s20 }
  0x17   :  { %4976 = sst [smem:[#allocation7_spill]] %s4376_s27 }
  0x18   :  { %4977 = sst [smem:[#allocation8_spill]] %s4381_s4 }
  0x19   :  { %s4391_s20 = sld [smem:[%s4962_s0 + %s4262_s15]]   ;;  %s4266_s15 = smov 23  }
  0x1a   :  { %s4396_s27 = sld [smem:[%s4962_s0 + %s4263_s22]]   ;;  %s4267_s22 = smov 24  }
  0x1b   :  { %4978 = sst [smem:[#allocation9_spill]] %s4386_s6 }
  0x1c   :  { %s4401_s4 = sld [smem:[%s4962_s0 + %s4264_s28]]   ;;  %s4268_s28 = smov 25  }
  0x1d   :  { %s4406_s6 = sld [smem:[%s4962_s0 + %s4265_s7]]   ;;  %s4269_s7 = smov 26  }
  0x1f   :  { %4979 = sst [smem:[#allocation10_spill]] %s4391_s20 }
  0x20   :  { %4980 = sst [smem:[#allocation11_spill]] %s4396_s27 }
  0x21   :  { %s4411_s20 = sld [smem:[%s4962_s0 + %s4266_s15]]   ;;  %s4270_s15 = smov 27  }
  0x22   :  { %4981 = sst [smem:[#allocation12_spill]] %s4401_s4 }
  0x23   :  { %4982 = sst [smem:[#allocation13_spill]] %s4406_s6 }
  0x24   :  { %s4416_s27 = sld [smem:[%s4962_s0 + %s4267_s22]]   ;;  %s4271_s22 = smov 28  }
  0x25   :  { %s4421_s4 = sld [smem:[%s4962_s0 + %s4268_s28]]   ;;  %s4272_s28 = smov 29  }
  0x26   :  { %s4426_s6 = sld [smem:[%s4962_s0 + %s4269_s7]]   ;;  %s4273_s7 = smov 30  }
  0x27   :  { %4983 = sst [smem:[#allocation14_spill]] %s4411_s20 }
  0x28   :  { %s4431_s20 = sld [smem:[%s4962_s0 + %s4270_s15]]   ;;  %s4274_s15 = smov 31  }
  0x2a   :  { %4984 = sst [smem:[#allocation15_spill]] %s4416_s27 }
  0x2b   :  { %4985 = sst [smem:[#allocation16_spill]] %s4421_s4 }
  0x2c   :  { %4986 = sst [smem:[#allocation17_spill]] %s4426_s6 }
  0x2d   :  { %s4436_s27 = sld [smem:[%s4962_s0 + %s4271_s22]]   ;;  %s4275_s22 = smov 32  }
  0x2e   :  { %4987 = sst [smem:[#allocation18_spill]] %s4431_s20 }
  0x2f   :  { %s4441_s4 = sld [smem:[%s4962_s0 + %s4272_s28]]   ;;  %s4276_s28 = smov 33  }
  0x30   :  { %s4446_s6 = sld [smem:[%s4962_s0 + %s4273_s7]]   ;;  %s4277_s7 = smov 34  }
  0x31   :  { %s4451_s20 = sld [smem:[%s4962_s0 + %s4274_s15]]   ;;  %s4278_s15 = smov 35  }
  0x33   :  { %4988 = sst [smem:[#allocation19_spill]] %s4436_s27 }
  0x34   :  { %s4456_s27 = sld [smem:[%s4962_s0 + %s4275_s22]]   ;;  %s4279_s22 = smov 36  }
  0x35   :  { %4989 = sst [smem:[#allocation20_spill]] %s4441_s4 }
  0x36   :  { %4990 = sst [smem:[#allocation21_spill]] %s4446_s6 }
  0x37   :  { %4991 = sst [smem:[#allocation22_spill]] %s4451_s20 }
  0x38   :  { %s4461_s4 = sld [smem:[%s4962_s0 + %s4276_s28]]   ;;  %s4280_s28 = smov 37  }
  0x39   :  { %s4466_s6 = sld [smem:[%s4962_s0 + %s4277_s7]]   ;;  %s4281_s7 = smov 38  }
  0x3a   :  { %4992 = sst [smem:[#allocation23_spill]] %s4456_s27 }
  0x3b   :  { %s4471_s20 = sld [smem:[%s4962_s0 + %s4278_s15]]   ;;  %s4282_s15 = smov 39  }
  0x3c   :  { %s4476_s27 = sld [smem:[%s4962_s0 + %s4279_s22]]   ;;  %s4283_s22 = smov 40  }
  0x3e   :  { %4993 = sst [smem:[#allocation24_spill]] %s4461_s4 }
  0x3f   :  { %4994 = sst [smem:[#allocation25_spill]] %s4466_s6 }
  0x40   :  { %s4481_s4 = sld [smem:[%s4962_s0 + %s4280_s28]]  }
  0x41   :  { %4995 = sst [smem:[#allocation26_spill]] %s4471_s20 }
  0x42   :  { %4996 = sst [smem:[#allocation27_spill]] %s4476_s27 }
  0x43   :  { %s4486_s6 = sld [smem:[%s4962_s0 + %s4281_s7]]  }
  0x44   :  { %s4491_s20 = sld [smem:[%s4962_s0 + %s4282_s15]]  }
  0x45   :  { %s4496_s27 = sld [smem:[%s4962_s0 + %s4283_s22]]  }
  0x46   :  { %v3892_v0 = vld [vmem:[%s4306_s13 + $0x4] ss:$12 sps:$4 sm:$0xff]   ;;  %v3894_v1 = vld [vmem:[%s4306_s13] ss:$12 sps:$4 sm:$0xff]   ;;  %v4284_v2 = vmov 0   ;;  %v4285_v3 = vmov 0.0  }
  0x47   :  { %361 = vmatprep.mubr.bf16.mxu0 %v4284_v2  ;;  %3556 = vmatprep.subr.bf16.mxu1 %v4285_v3  ;;  %v3895_v4 = vld [vmem:[%s4306_s13 + $0x1c] ss:$12 sps:$4 sm:$0xff]   ;;  %vm4286_vm0 = vmmov 0   ;;  %v3897_v5 = vld [vmem:[%s4306_s13 + $0x18] ss:$12 sps:$4 sm:$0xff]  }
  0x48   :  { %329 = vmatprep.subr.bf16.mxu0 %v3892_v0  ;;  %3572 = vmatprep.mubr.msk.bf16.mxu1 %vm4286_vm0, %v4285_v3  ;;  %v3898_v6 = vld [vmem:[%s4306_s13 + $0x34] ss:$12 sps:$4 sm:$0xff]   ;;  %v3900_v7 = vld [vmem:[%s4306_s13 + $0x30] ss:$12 sps:$4 sm:$0xff]   ;;  %v3901_v8 = vld [vmem:[%s4306_s13 + $0x4c] ss:$12 sps:$4 sm:$0xff]  }
  0x49   :  { %330 = vmatpush1.bf16.msra.mxu0 %v3894_v1  ;;  %v3903_v9 = vld [vmem:[%s4306_s13 + $0x48] ss:$12 sps:$4 sm:$0xff]   ;;  %v3904_v11 = vld [vmem:[%s4306_s13 + $0x64] ss:$12 sps:$4 sm:$0xff]   ;;  %v3917_v12 = vld [vmem:[%s4306_s13 + $0x20] ss:$12 sps:$4 sm:$0xff]  }
  0x4a   :  { %331 = vmatprep.subr.bf16.mxu0 %v3895_v4  ;;  %v3916_v10 = vld [vmem:[%s4306_s13 + $0x8] ss:$12 sps:$4 sm:$0xff]   ;;  %v3906_v13 = vld [vmem:[%s4306_s13 + $0x60] ss:$12 sps:$4 sm:$0xff]   ;;  %v3909_v15 = vld [vmem:[%s4306_s13 + $0x78] ss:$12 sps:$4 sm:$0xff]  }
  0x4b   :  { %3557 = vmatpush3.bf16.msra.mxu1 %v3916_v10  ;;  %v3907_v14 = vld [vmem:[%s4306_s13 + $0x7c] ss:$12 sps:$4 sm:$0xff]   ;;  %v3918_v16 = vld [vmem:[%s4306_s13 + $0x38] ss:$12 sps:$4 sm:$0xff]   ;;  %v3910_v17 = vld [vmem:[%s4306_s13 + $0x94] ss:$12 sps:$4 sm:$0xff]  }
  0x4c   :  { %3558 = vmatprep.subr.bf16.mxu1 %v4285_v3  ;;  %v3919_v18 = vld [vmem:[%s4306_s13 + $0x50] ss:$12 sps:$4 sm:$0xff]   ;;  %v3913_v20 = vld [vmem:[%s4306_s13 + $0xac] ss:$12 sps:$4 sm:$0xff]   ;;  %v3920_v21 = vld [vmem:[%s4306_s13 + $0x68] ss:$12 sps:$4 sm:$0xff]  }
  0x4d   :  { %332 = vmatpush1.bf16.msra.mxu0 %v3897_v5  ;;  %v3912_v19 = vld [vmem:[%s4306_s13 + $0x90] ss:$12 sps:$4 sm:$0xff]   ;;  %v3915_v22 = vld [vmem:[%s4306_s13 + $0xa8] ss:$12 sps:$4 sm:$0xff]   ;;  %v3921_v23 = vld [vmem:[%s4306_s13 + $0x80] ss:$12 sps:$4 sm:$0xff]  }
  0x4e   :  { %333 = vmatprep.subr.bf16.mxu0 %v3898_v6  ;;  %v168_v24 = vld [vmem:[%s4301_s9] sm:$0xf]  ;;  %v3922_v25 = vld [vmem:[%s4306_s13 + $0x98] ss:$12 sps:$4 sm:$0xff]   ;;  %v3923_v26 = vld [vmem:[%s4306_s13 + $0xb0] ss:$12 sps:$4 sm:$0xff]  }
  0x4f   :  { %3559 = vmatpush3.bf16.msra.mxu1 %v3917_v12 }
  0x50   :  { %3560 = vmatprep.subr.bf16.mxu1 %v4285_v3 }
  0x51   :  { %334 = vmatpush1.bf16.msra.mxu0 %v3900_v7 }
  0x52   :  { %335 = vmatprep.subr.bf16.mxu0 %v3901_v8 }
  0x53   :  { %3561 = vmatpush3.bf16.msra.mxu1 %v3918_v16 }
  0x54   :  { %3562 = vmatprep.subr.bf16.mxu1 %v4285_v3 }
  0x55   :  { %336 = vmatpush1.bf16.msra.mxu0 %v3903_v9 }
  0x56   :  { %337 = vmatprep.subr.bf16.mxu0 %v3904_v11 }
  0x57   :  { %3563 = vmatpush3.bf16.msra.mxu1 %v3919_v18 }
  0x58   :  { %3564 = vmatprep.subr.bf16.mxu1 %v4285_v3 }
  0x59   :  { %338 = vmatpush1.bf16.msra.mxu0 %v3906_v13 }
  0x5a   :  { %339 = vmatprep.subr.bf16.mxu0 %v3907_v14 }
  0x5b   :  { %3565 = vmatpush3.bf16.msra.mxu1 %v3920_v21 }
  0x5c   :  { %3566 = vmatprep.subr.bf16.mxu1 %v4285_v3 }
  0x5d   :  { %340 = vmatpush1.bf16.msra.mxu0 %v3909_v15 }
  0x5e   :  { %341 = vmatprep.subr.bf16.mxu0 %v3910_v17 }
  0x5f   :  { %3567 = vmatpush3.bf16.msra.mxu1 %v3921_v23 }
  0x60   :  { %3568 = vmatprep.subr.bf16.mxu1 %v4285_v3 }
  0x61   :  { %342 = vmatpush1.bf16.msra.mxu0 %v3912_v19 }
  0x62   :  { %343 = vmatprep.subr.bf16.mxu0 %v3913_v20 }
  0x63   :  { %3569 = vmatpush3.bf16.msra.mxu1 %v3922_v25 }
  0x64   :  { %3570 = vmatprep.subr.bf16.mxu1 %v4285_v3 }
  0x65   :  { %344 = vmatpush1.bf16.msra.mxu0 %v3915_v22 }
  0x67   :  { %3571 = vmatpush3.bf16.msra.mxu1 %v3923_v26 }
  0x68   :  { %362 = vmatmul.mubr.bf16.vlgmr.msra.gmra.mrb[0].mxu0 %v168_v24 }
  0x6a   :  { %3573 = vmatmul.mubr.bf16.vlgmr.msra.gmra.mrb[0].mxu1 %v168_v24 }
  0x6b   :  { %477 = vmatprep.mubr.bf16.mxu1 %v4284_v2 }
  0x6c   :  { %86 = vsyncpa [#allocation3], 0  ;;  %v3924_v27 = vld [vmem:[%s4316_s21] ss:$8 sps:$4 sm:$0xff]   ;;  %v3926_v28 = vld [vmem:[%s4316_s21 + $0x4] ss:$8 sps:$4 sm:$0xff]  }
  0x6d   :  { %v3929_v29 = vld [vmem:[%s4316_s21 + $0x14] ss:$8 sps:$4 sm:$0xff]   ;;  %832 = vmatprep.subr.bf16.mxu0 %v3926_v28  ;;  %v3927_v30 = vld [vmem:[%s4316_s21 + $0x10] ss:$8 sps:$4 sm:$0xff]   ;;  %v3932_v31 = vld [vmem:[%s4316_s21 + $0x24] ss:$8 sps:$4 sm:$0xff]  }
  0x6e   :  { %833 = vmatpush1.bf16.msra.mxu0 %v3924_v27  ;;  %v3930_v32 = vld [vmem:[%s4316_s21 + $0x20] ss:$8 sps:$4 sm:$0xff]   ;;  %v3935_v33 = vld [vmem:[%s4316_s21 + $0x34] ss:$8 sps:$4 sm:$0xff]   ;;  %v3933_v34 = vld [vmem:[%s4316_s21 + $0x30] ss:$8 sps:$4 sm:$0xff]  }
  0x6f   :  { %834 = vmatprep.subr.bf16.mxu0 %v3929_v29  ;;  %v3938_v35 = vld [vmem:[%s4316_s21 + $0x44] ss:$8 sps:$4 sm:$0xff]   ;;  %v3936_v36 = vld [vmem:[%s4316_s21 + $0x40] ss:$8 sps:$4 sm:$0xff]   ;;  %v3941_v37 = vld [vmem:[%s4316_s21 + $0x54] ss:$8 sps:$4 sm:$0xff]  }
  0x70   :  { %v3939_v38 = vld [vmem:[%s4316_s21 + $0x50] ss:$8 sps:$4 sm:$0xff]   ;;  %v3944_v39 = vld [vmem:[%s4316_s21 + $0x64] ss:$8 sps:$4 sm:$0xff]   ;;  %v3942_v40 = vld [vmem:[%s4316_s21 + $0x60] ss:$8 sps:$4 sm:$0xff]  }
  0x71   :  { %v3947_v41 = vld [vmem:[%s4316_s21 + $0x74] ss:$8 sps:$4 sm:$0xff]   ;;  %v3945_v42 = vld [vmem:[%s4316_s21 + $0x70] ss:$8 sps:$4 sm:$0xff]   ;;  %v3950_v43 = vld [vmem:[%s4316_s21 + $0x84] ss:$8 sps:$4 sm:$0xff]  }
  0x72   :  { %835 = vmatpush1.bf16.msra.mxu0 %v3927_v30  ;;  %v3948_v44 = vld [vmem:[%s4316_s21 + $0x80] ss:$8 sps:$4 sm:$0xff]   ;;  %v3953_v45 = vld [vmem:[%s4316_s21 + $0x94] ss:$8 sps:$4 sm:$0xff]   ;;  %v3951_v46 = vld [vmem:[%s4316_s21 + $0x90] ss:$8 sps:$4 sm:$0xff]  }
  0x73   :  { %836 = vmatprep.subr.bf16.mxu0 %v3932_v31  ;;  %v3956_v47 = vld [vmem:[%s4316_s21 + $0xa4] ss:$8 sps:$4 sm:$0xff]   ;;  %v3954_v48 = vld [vmem:[%s4316_s21 + $0xa0] ss:$8 sps:$4 sm:$0xff]   ;;  %v3959_v49 = vld [vmem:[%s4316_s21 + $0xb4] ss:$8 sps:$4 sm:$0xff]  }
  0x74   :  { %v3957_v50 = vld [vmem:[%s4316_s21 + $0xb0] ss:$8 sps:$4 sm:$0xff]   ;;  %v3962_v51 = vld [vmem:[%s4316_s21 + $0xc4] ss:$8 sps:$4 sm:$0xff]   ;;  %v3960_v52 = vld [vmem:[%s4316_s21 + $0xc0] ss:$8 sps:$4 sm:$0xff]  }
  0x75   :  { %v3965_v53 = vld [vmem:[%s4316_s21 + $0xd4] ss:$8 sps:$4 sm:$0xff]   ;;  %v3963_v54 = vld [vmem:[%s4316_s21 + $0xd0] ss:$8 sps:$4 sm:$0xff]   ;;  %vm435_vm1 = vcmask 1043456   ;;  %vm431_vm2 = vcmask 64512  }
  0x76   :  { %837 = vmatpush1.bf16.msra.mxu0 %v3930_v32  ;;  %v410_v62 = vld [vmem:[%s4296_s5] sm:$0xf]  ;;  %v3968_v7 = vld [vmem:[%s4316_s21 + $0xe4] ss:$8 sps:$4 sm:$0xff]   ;;  %v3971_v9 = vld [vmem:[%s4316_s21 + $0xf4] ss:$8 sps:$4 sm:$0xff]  }
  0x77   :  { %838 = vmatprep.subr.bf16.mxu0 %v3935_v33  ;;  %v3966_v8 = vld [vmem:[%s4316_s21 + $0xe0] ss:$8 sps:$4 sm:$0xff]   ;;  %v3969_v10 = vld [vmem:[%s4316_s21 + $0xf0] ss:$8 sps:$4 sm:$0xff]   ;;  %v3974_v11 = vld [vmem:[%s4316_s21 + $0x104] ss:$8 sps:$4 sm:$0xff]  }
  0x78   :  { %v3996_v12 = vld [vmem:[%s4326_s29] ss:$8 sps:$4 sm:$0xff]   ;;  %v3998_v13 = vld [vmem:[%s4326_s29 + $0x4] ss:$8 sps:$4 sm:$0xff]   ;;  %v4001_v14 = vld [vmem:[%s4326_s29 + $0x14] ss:$8 sps:$4 sm:$0xff]  }
  0x79   :  { %v3999_v15 = vld [vmem:[%s4326_s29 + $0x10] ss:$8 sps:$4 sm:$0xff]   ;;  %v4004_v16 = vld [vmem:[%s4326_s29 + $0x24] ss:$8 sps:$4 sm:$0xff]   ;;  %v4002_v17 = vld [vmem:[%s4326_s29 + $0x20] ss:$8 sps:$4 sm:$0xff]  }
  0x7a   :  { %839 = vmatpush1.bf16.msra.mxu0 %v3933_v34  ;;  %v4007_v18 = vld [vmem:[%s4326_s29 + $0x34] ss:$8 sps:$4 sm:$0xff]   ;;  %v4005_v19 = vld [vmem:[%s4326_s29 + $0x30] ss:$8 sps:$4 sm:$0xff]   ;;  %v4010_v20 = vld [vmem:[%s4326_s29 + $0x44] ss:$8 sps:$4 sm:$0xff]  }
  0x7b   :  { %840 = vmatprep.subr.bf16.mxu0 %v3938_v35  ;;  %v4008_v21 = vld [vmem:[%s4326_s29 + $0x40] ss:$8 sps:$4 sm:$0xff]   ;;  %v4013_v22 = vld [vmem:[%s4326_s29 + $0x54] ss:$8 sps:$4 sm:$0xff]   ;;  %v4011_v23 = vld [vmem:[%s4326_s29 + $0x50] ss:$8 sps:$4 sm:$0xff]  }
  0x7c   :  { %v4016_v24 = vld [vmem:[%s4326_s29 + $0x64] ss:$8 sps:$4 sm:$0xff]   ;;  %v4014_v25 = vld [vmem:[%s4326_s29 + $0x60] ss:$8 sps:$4 sm:$0xff]   ;;  %v4019_v26 = vld [vmem:[%s4326_s29 + $0x74] ss:$8 sps:$4 sm:$0xff]  }
  0x7d   :  { %v4017_v27 = vld [vmem:[%s4326_s29 + $0x70] ss:$8 sps:$4 sm:$0xff]   ;;  %v4022_v28 = vld [vmem:[%s4326_s29 + $0x84] ss:$8 sps:$4 sm:$0xff]   ;;  %v4020_v29 = vld [vmem:[%s4326_s29 + $0x80] ss:$8 sps:$4 sm:$0xff]  }
  0x7e   :  { %841 = vmatpush1.bf16.msra.mxu0 %v3936_v36  ;;  %v4025_v30 = vld [vmem:[%s4326_s29 + $0x94] ss:$8 sps:$4 sm:$0xff]   ;;  %v4023_v31 = vld [vmem:[%s4326_s29 + $0x90] ss:$8 sps:$4 sm:$0xff]   ;;  %v4028_v32 = vld [vmem:[%s4326_s29 + $0xa4] ss:$8 sps:$4 sm:$0xff]  }
  0x7f   :  { %842 = vmatprep.subr.bf16.mxu0 %v3941_v37  ;;  %v4026_v33 = vld [vmem:[%s4326_s29 + $0xa0] ss:$8 sps:$4 sm:$0xff]   ;;  %v4031_v34 = vld [vmem:[%s4326_s29 + $0xb4] ss:$8 sps:$4 sm:$0xff]   ;;  %v4029_v35 = vld [vmem:[%s4326_s29 + $0xb0] ss:$8 sps:$4 sm:$0xff]  }
  0x80   :  { %v4034_v36 = vld [vmem:[%s4326_s29 + $0xc4] ss:$8 sps:$4 sm:$0xff]   ;;  %v4032_v37 = vld [vmem:[%s4326_s29 + $0xc0] ss:$8 sps:$4 sm:$0xff]   ;;  %s4997_s0 = sld [smem:[#allocation7_spill]]  ;;  %s4998_s5 = sld [smem:[#allocation5_spill]] }
  0x81   :  { %s4999_s9 = sld [smem:[#allocation9_spill]]  ;;  %s5000_s13 = sld [smem:[#allocation6_spill]] }
  0x82   :  { %843 = vmatpush1.bf16.msra.mxu0 %v3939_v38  ;;  %v4037_v38 = vld [vmem:[%s4326_s29 + $0xd4] ss:$8 sps:$4 sm:$0xff]   ;;  %s5012_s28 = sld [smem:[#allocation18_spill]]  ;;  %s5013_s1 = sld [smem:[#allocation23_spill]] }
  0x83   :  { %844 = vmatprep.subr.bf16.mxu0 %v3944_v39  ;;  %v4035_v39 = vld [vmem:[%s4326_s29 + $0xd0] ss:$8 sps:$4 sm:$0xff]   ;;  %s5014_s2 = sld [smem:[#allocation20_spill]]  ;;  %s5015_s7 = sld [smem:[#allocation25_spill]] }
  0x84   :  { %s5016_s10 = sld [smem:[#allocation22_spill]]  ;;  %s5017_s11 = sld [smem:[#allocation27_spill]] }
  0x85   :  { %s5018_s15 = sld [smem:[#allocation24_spill]]  ;;  %s5019_s16 = sld [smem:[#allocation26_spill]] }
  0x86   :  { %845 = vmatpush1.bf16.msra.mxu0 %v3942_v40  ;;  %v416_v40 = vlaneseq  ;;  %s4287_s18 = smov [#allocation2]  }
  0x87   :  { %846 = vmatprep.subr.bf16.mxu0 %v3947_v41  ;;  %s3108_s22 = sshll.u32 %s4287_s18, 4  ;;  %s3109_s22 = int_to_ptr.vmem [resolvable:$true] %s3108_s22 }
  0x88   :  { %v417_v41 = vshrl.u32 %v416_v40, 7  ;;  %v4048_v40 = vld [vmem:[%s4336_s8 + $0x20] sm:$0xff]   ;;  %p4225_p1 = scmp.lt.s32.totalorder %s3109_s22, %s3109_s22 }
  0x8a   :  { %847 = vmatpush1.bf16.msra.mxu0 %v3945_v42  ;;  %v4603_v42 = vsub.s32 0, %v417_v41 }
  0x8b   :  { %848 = vmatprep.subr.bf16.mxu0 %v3950_v43  ;;  %v414_v43 = vld [vmem:[%s4311_s17] sm:$0x7]  ;;  %s5001_s17 = sld [smem:[#allocation11_spill]] }
  0x8e   :  { %849 = vmatpush1.bf16.msra.mxu0 %v3948_v44  ;;  %v4606_v44 = vsub.s32 1, %v417_v41 }
  0x8f   :  { %850 = vmatprep.subr.bf16.mxu0 %v3953_v45  ;;  %v419_v45 = vrot.slane %v414_v43, %v4603_v42 }
  0x92   :  { %851 = vmatpush1.bf16.msra.mxu0 %v3951_v46  ;;  %v423_v46 = vrot.slane %v414_v43, %v4606_v44 }
  0x93   :  { %852 = vmatprep.subr.bf16.mxu0 %v3956_v47 }
  0x96   :  { %853 = vmatpush1.bf16.msra.mxu0 %v3954_v48 }
  0x97   :  { %854 = vmatprep.subr.bf16.mxu0 %v3959_v49 }
  0x9a   :  { %855 = vmatpush1.bf16.msra.mxu0 %v3957_v50 }
  0x9b   :  { %856 = vmatprep.subr.bf16.mxu0 %v3962_v51 }
  0x9e   :  { %857 = vmatpush1.bf16.msra.mxu0 %v3960_v52 }
  0x9f   :  { %858 = vmatprep.subr.bf16.mxu0 %v3965_v53 }
  0xa2   :  { %859 = vmatpush1.bf16.msra.mxu0 %v3963_v54 }
  0xa3   :  { %860 = vmatprep.subr.bf16.mxu0 %v3968_v7  ;;  %v426_v7 = vsub.s32 2, %v417_v41  ;;  %v4049_v41 = vld [vmem:[%s4336_s8 + $0x28] sm:$0xff]  }
  0xa6   :  { %861 = vmatpush1.bf16.msra.mxu0 %v3966_v8  ;;  %v3984_v8 = vld [vmem:[%s4316_s21 + $0x140] ss:$8 sps:$4 sm:$0xff]  }
  0xa7   :  { %862 = vmatprep.subr.bf16.mxu0 %v3971_v9  ;;  %v3989_v9 = vld [vmem:[%s4316_s21 + $0x154] ss:$8 sps:$4 sm:$0xff]  }
  0xaa   :  { %863 = vmatpush1.bf16.msra.mxu0 %v3969_v10  ;;  %v427_v10 = vrot.slane %v414_v43, %v426_v7  ;;  %v4050_v43 = vld [vmem:[%s4336_s8 + $0x30] sm:$0xff]   ;;  %v3263_v7 = vld [vmem:[%s4341_s14] ss:$0 sm:$0xff]  ;;  %s5007_s14 = sld [smem:[#allocation17_spill]] }
  0xab   :  { %873 = vmatprep.subr.bf16.mxu0 %v3974_v11  ;;  %v3987_v11 = vld [vmem:[%s4316_s21 + $0x150] ss:$8 sps:$4 sm:$0xff]  }
 0x13b   :  { %v363_v55 = vpop.f32.mrb[0].mxu0 }
 0x13c   :  { %v411_v56 = vpack.c.bf16 %v363_v55, %v363_v55  ;;  %v365_v57 = vpop.f32.mrb[1].mxu0 }
 0x13d   :  { %v412_v58 = vpack.c.bf16 %v365_v57, %v365_v57  ;;  %v367_v59 = vpop.f32.mrb[2].mxu0  ;;  %v404_v63 = vpop.f32.mrb[0].mxu1 }
 0x13e   :  { %v437_v60 = vsel %vm435_vm1, %v411_v56, 0  ;;  %v368_v61 = vpop.f32.mrb[3].mxu0  ;;  %v413_v0 = vpack.c.bf16 %v404_v63, %v404_v63  ;;  %v3574_v1 = vpop.f32.mrb[1].mxu1  ;;  %v3972_v56 = vld [vmem:[%s4316_s21 + $0x100] ss:$8 sps:$4 sm:$0xff]  }
 0x13f   :  { %3180 = vmatprep.subr.msk.bf16.mxu1 %vm435_vm1, %v412_v58  ;;  %v407_v4 = vpop.f32.mrb[2].mxu1  ;;  %v3977_v58 = vld [vmem:[%s4316_s21 + $0x114] ss:$8 sps:$4 sm:$0xff]   ;;  %v3978_v1 = vld [vmem:[%s4316_s21 + $0x120] ss:$8 sps:$4 sm:$0xff]  }
 0x140   :  { %446 = vmatpush1.bf16.msra.mxu1 %v437_v60  ;;  %v443_v5 = vsel %vm435_vm1, %v413_v0, 0  ;;  %v3575_v6 = vpop.f32.mrb[3].mxu1  ;;  %v3975_v60 = vld [vmem:[%s4316_s21 + $0x110] ss:$8 sps:$4 sm:$0xff]   ;;  %v3983_v4 = vld [vmem:[%s4316_s21 + $0x134] ss:$8 sps:$4 sm:$0xff]  }
 0x141   :  { %3576 = vmatprep.subr.bf16.mxu1 %v4285_v3  ;;  %v3986_v6 = vld [vmem:[%s4316_s21 + $0x144] ss:$8 sps:$4 sm:$0xff]  }
 0x143   :  { %3181 = vmatmul.mubr.msk.bf16.vlgmr.msra.gmra.mrb[4].mxu1 %vm431_vm2, %v410_v62 }
 0x144   :  { %3578 = vmatprep.mubr.msk.bf16.mxu1 %vm4286_vm0, %v4285_v3  ;;  %3577 = vmatpush3.bf16.msra.mxu1 %v443_v5  ;;  %v3981_v5 = vld [vmem:[%s4316_s21 + $0x130] ss:$8 sps:$4 sm:$0xff]  }
 0x145   :  { %1122 = vmatprep.subr.bf16.mxu1 %v3998_v13 }
 0x14b   :  { %3579 = vmatmul.mubr.msk.bf16.vlgmr.msra.gmra.mrb[8].mxu1 %vm431_vm2, %v410_v62  ;;  %v3980_v62 = vld [vmem:[%s4316_s21 + $0x124] ss:$8 sps:$4 sm:$0xff]  }
 0x14c   :  { %1123 = vmatpush1.bf16.msra.mxu1 %v3996_v12  ;;  %v3992_v12 = vld [vmem:[%s4316_s21 + $0x164] ss:$8 sps:$4 sm:$0xff]  }
 0x14d   :  { %1124 = vmatprep.subr.bf16.mxu1 %v4001_v14  ;;  %v3990_v14 = vld [vmem:[%s4316_s21 + $0x160] ss:$8 sps:$4 sm:$0xff]  }
 0x150   :  { %1125 = vmatpush1.bf16.msra.mxu1 %v3999_v15  ;;  %v3995_v15 = vld [vmem:[%s4316_s21 + $0x174] ss:$8 sps:$4 sm:$0xff]  }
 0x151   :  { %1126 = vmatprep.subr.bf16.mxu1 %v4004_v16 }
 0x154   :  { %1127 = vmatpush1.bf16.msra.mxu1 %v4002_v17  ;;  %v3993_v17 = vld [vmem:[%s4316_s21 + $0x170] ss:$8 sps:$4 sm:$0xff]   ;;  %s5002_s21 = sld [smem:[#allocation8_spill]] }
 0x155   :  { %1128 = vmatprep.subr.bf16.mxu1 %v4007_v18 }
 0x158   :  { %1129 = vmatpush1.bf16.msra.mxu1 %v4005_v19  ;;  %v4040_v19 = vld [vmem:[%s4326_s29 + $0xe4] ss:$8 sps:$4 sm:$0xff]  }
 0x159   :  { %1130 = vmatprep.subr.bf16.mxu1 %v4010_v20  ;;  %v4038_v20 = vld [vmem:[%s4326_s29 + $0xe0] ss:$8 sps:$4 sm:$0xff]  }
 0x15c   :  { %1131 = vmatpush1.bf16.msra.mxu1 %v4008_v21  ;;  %v4043_v21 = vld [vmem:[%s4326_s29 + $0xf4] ss:$8 sps:$4 sm:$0xff]  }
 0x15d   :  { %1132 = vmatprep.subr.bf16.mxu1 %v4013_v22  ;;  %v4041_v22 = vld [vmem:[%s4326_s29 + $0xf0] ss:$8 sps:$4 sm:$0xff]   ;;  %s5004_s29 = sld [smem:[#allocation10_spill]] }
 0x160   :  { %1133 = vmatpush1.bf16.msra.mxu1 %v4011_v23  ;;  %v580_v23 = vld [vmem:[%s4321_s25] sm:$0x3]  ;;  %s5003_s25 = sld [smem:[#allocation13_spill]] }
 0x161   :  { %1134 = vmatprep.subr.bf16.mxu1 %v4016_v24  ;;  %v585_v24 = vrot.slane %v580_v23, %v4603_v42 }
 0x164   :  { %1135 = vmatpush1.bf16.msra.mxu1 %v4014_v25  ;;  %v589_v25 = vrot.slane %v580_v23, %v4606_v44  ;;  %v4073_v23 = vld [vmem:[%s4366_s12 + $0x14] ss:$8 sps:$4 sm:$0xff]  }
 0x165   :  { %1136 = vmatprep.subr.bf16.mxu1 %v4019_v26 }
 0x168   :  { %1137 = vmatpush1.bf16.msra.mxu1 %v4017_v27 }
 0x169   :  { %1138 = vmatprep.subr.bf16.mxu1 %v4022_v28 }
 0x16c   :  { %1139 = vmatpush1.bf16.msra.mxu1 %v4020_v29 }
 0x16d   :  { %1140 = vmatprep.subr.bf16.mxu1 %v4025_v30 }
 0x170   :  { %1141 = vmatpush1.bf16.msra.mxu1 %v4023_v31 }
 0x171   :  { %1142 = vmatprep.subr.bf16.mxu1 %v4028_v32 }
 0x174   :  { %1143 = vmatpush1.bf16.msra.mxu1 %v4026_v33 }
 0x175   :  { %1144 = vmatprep.subr.bf16.mxu1 %v4031_v34 }
 0x178   :  { %1145 = vmatpush1.bf16.msra.mxu1 %v4029_v35  ;;  %v4044_v35 = vld [vmem:[%s4336_s8] sm:$0xff]  }
 0x179   :  { %1146 = vmatprep.subr.bf16.mxu1 %v4034_v36 }
 0x17c   :  { %1147 = vmatpush1.bf16.msra.mxu1 %v4032_v37  ;;  %v4045_v37 = vld [vmem:[%s4336_s8 + $0x8] sm:$0xff]  }
 0x17d   :  { %1148 = vmatprep.subr.bf16.mxu1 %v4037_v38  ;;  %v4046_v38 = vld [vmem:[%s4336_s8 + $0x10] sm:$0xff]  }
 0x180   :  { %1149 = vmatpush1.bf16.msra.mxu1 %v4035_v39  ;;  %v4047_v39 = vld [vmem:[%s4336_s8 + $0x18] sm:$0xff]  }
 0x181   :  { %1150 = vmatprep.subr.bf16.mxu1 %v4040_v19  ;;  %v4066_v19 = vld [vmem:[%s4356_s30 + $0x30] sm:$0xff]  }
 0x184   :  { %1151 = vmatpush1.bf16.msra.mxu1 %v4038_v20  ;;  %v4067_v20 = vld [vmem:[%s4356_s30 + $0x38] sm:$0xff]  }
 0x185   :  { %1152 = vmatprep.subr.bf16.mxu1 %v4043_v21  ;;  %v4068_v21 = vld [vmem:[%s4366_s12] ss:$8 sps:$4 sm:$0xff]  }
 0x188   :  { %1153 = vmatpush1.bf16.msra.mxu1 %v4041_v22  ;;  %v4070_v22 = vld [vmem:[%s4366_s12 + $0x4] ss:$8 sps:$4 sm:$0xff]  }
 0x189   :  { %3582 = vmatprep.subr.bf16.mxu1 %v4285_v3 }
 0x216   :  { %v479_v47 = vpop.f32.mrb[4].mxu1 }
 0x217   :  { %v480_v48 = vadd.f32 %v479_v47, %v419_v45  ;;  %v481_v49 = vpop.f32.mrb[5].mxu1  ;;  %v4051_v45 = vld [vmem:[%s4336_s8 + $0x38] sm:$0xff]   ;;  %v4053_v47 = vld [vmem:[%s4346_s19 + $0x8] sm:$0xff]   ;;  %s5006_s8 = sld [smem:[#allocation12_spill]] }
 0x218   :  { %v482_v50 = vadd.f32 %v481_v49, %v423_v46  ;;  %v483_v51 = vpop.f32.mrb[6].mxu1  ;;  %v4052_v46 = vld [vmem:[%s4346_s19] sm:$0xff]   ;;  %v4055_v49 = vld [vmem:[%s4346_s19 + $0x18] sm:$0xff]  }
 0x219   :  { %v526_v52 = vmax.f32 %v480_v48, 0.0  ;;  %v484_v53 = vpop.f32.mrb[7].mxu1  ;;  %v4054_v48 = vld [vmem:[%s4346_s19 + $0x10] sm:$0xff]   ;;  %v950_v51 = vld [vmem:[%s4331_s3] sm:$0x3]  ;;  %s5005_s3 = sld [smem:[#allocation15_spill]] }
 0x21a   :  { %v527_v54 = vmax.f32 %v482_v50, 0.0  ;;  %v4056_v50 = vld [vmem:[%s4346_s19 + $0x20] sm:$0xff]  }
 0x21b   :  { %v529_v57 = vpack.c.bf16 %v526_v52, %v526_v52  ;;  %v955_v52 = vrot.slane %v950_v51, %v4603_v42 }
 0x21c   :  { %v530_v55 = vpack.c.bf16 %v527_v54, %v527_v54 }
 0x21e   :  { %864 = vmatprep.mubr.bf16.mxu0 %v530_v55  ;;  %v520_v59 = vpop.f32.mrb[8].mxu1 }
 0x21f   :  { %865 = vmatmul.mubr.bf16.vlgmr.msra.gmra.mrb[4].mxu0 %v529_v57  ;;  %v3580_v61 = vpop.f32.mrb[9].mxu1  ;;  %v521_v13 = vadd.f32 %v520_v59, %v427_v10 }
 0x220   :  { %874 = vmatpush1.bf16.msra.mxu0 %v3972_v56  ;;  %905 = vmatprep.mubr.bf16.mxu0 %v4284_v2  ;;  %v523_v63 = vpop.f32.mrb[10].mxu1  ;;  %v4058_v61 = vld [vmem:[%s4346_s19 + $0x30] sm:$0xff]  }
 0x221   :  { %875 = vmatprep.subr.bf16.mxu0 %v3977_v58  ;;  %v3581_v0 = vpop.f32.mrb[11].mxu1  ;;  %v528_v16 = vmax.f32 %v521_v13, 0.0  ;;  %v4060_v63 = vld [vmem:[%s4356_s30] sm:$0xff]  }
 0x222   :  { %v4061_v0 = vld [vmem:[%s4356_s30 + $0x8] sm:$0xff]  }
 0x223   :  { %v531_v18 = vpack.c.bf16 %v528_v16, %v528_v16 }
 0x224   :  { %876 = vmatpush1.bf16.msra.mxu0 %v3975_v60  ;;  %v4057_v60 = vld [vmem:[%s4346_s19 + $0x28] sm:$0xff]  }
 0x225   :  { %877 = vmatprep.subr.bf16.mxu0 %v3980_v62  ;;  %v4059_v62 = vld [vmem:[%s4346_s19 + $0x38] sm:$0xff]   ;;  %s5008_s19 = sld [smem:[#allocation14_spill]] }
 0x228   :  { %878 = vmatpush1.bf16.msra.mxu0 %v3978_v1  ;;  %v4062_v1 = vld [vmem:[%s4356_s30 + $0x10] sm:$0xff]  }
 0x229   :  { %879 = vmatprep.subr.bf16.mxu0 %v3983_v4  ;;  %v4063_v4 = vld [vmem:[%s4356_s30 + $0x18] sm:$0xff]  }
 0x22c   :  { %880 = vmatpush1.bf16.msra.mxu0 %v3981_v5  ;;  %v4064_v5 = vld [vmem:[%s4356_s30 + $0x20] sm:$0xff]  }
 0x22d   :  { %881 = vmatprep.subr.bf16.mxu0 %v3986_v6  ;;  %v4065_v6 = vld [vmem:[%s4356_s30 + $0x28] sm:$0xff]   ;;  %s5010_s30 = sld [smem:[#allocation16_spill]] }
 0x230   :  { %882 = vmatpush1.bf16.msra.mxu0 %v3984_v8  ;;  %v959_v8 = vrot.slane %v950_v51, %v4606_v44  ;;  %v4096_v51 = vld [vmem:[%s4997_s0 + $0x20] sm:$0xff]  }
 0x231   :  { %883 = vmatprep.subr.bf16.mxu0 %v3989_v9 }
 0x234   :  { %884 = vmatpush1.bf16.msra.mxu0 %v3987_v11 }
 0x235   :  { %885 = vmatprep.subr.bf16.mxu0 %v3992_v12 }
 0x238   :  { %886 = vmatpush1.bf16.msra.mxu0 %v3990_v14 }
 0x239   :  { %887 = vmatprep.subr.bf16.mxu0 %v3995_v15 }
 0x23c   :  { %888 = vmatpush1.bf16.msra.mxu0 %v3993_v17 }
 0x23d   :  { %3602 = vmatprep.subr.bf16.mxu0 %v4285_v3 }
 0x23f   :  { %906 = vmatmul.mubr.bf16.vlgmr.msra.gmra.mrb[4].mxu0 %v531_v18 }
 0x240   :  { %3618 = vmatprep.mubr.msk.bf16.mxu0 %vm4286_vm0, %v4285_v3  ;;  %3603 = vmatpush3.bf16.msra.mxu0 %v4052_v46  ;;  %v4089_v46 = vld [vmem:[%s4366_s12 + $0x70] ss:$8 sps:$4 sm:$0xff]  }
 0x241   :  { %3604 = vmatprep.subr.bf16.mxu0 %v4285_v3 }
 0x244   :  { %3605 = vmatpush3.bf16.msra.mxu0 %v4053_v47  ;;  %v4092_v47 = vld [vmem:[%s4997_s0] sm:$0xff]  }
 0x245   :  { %3606 = vmatprep.subr.bf16.mxu0 %v4285_v3 }
 0x248   :  { %3607 = vmatpush3.bf16.msra.mxu0 %v4054_v48  ;;  %v4093_v48 = vld [vmem:[%s4997_s0 + $0x8] sm:$0xff]  }
 0x249   :  { %3608 = vmatprep.subr.bf16.mxu0 %v4285_v3 }
 0x24c   :  { %3609 = vmatpush3.bf16.msra.mxu0 %v4055_v49  ;;  %v4094_v49 = vld [vmem:[%s4997_s0 + $0x10] sm:$0xff]  }
 0x24d   :  { %3610 = vmatprep.subr.bf16.mxu0 %v4285_v3 }
 0x250   :  { %3611 = vmatpush3.bf16.msra.mxu0 %v4056_v50  ;;  %v4095_v50 = vld [vmem:[%s4997_s0 + $0x18] sm:$0xff]  }
 0x251   :  { %3612 = vmatprep.subr.bf16.mxu0 %v4285_v3 }
 0x254   :  { %3613 = vmatpush3.bf16.msra.mxu0 %v4057_v60 }
 0x255   :  { %3614 = vmatprep.subr.bf16.mxu0 %v4285_v3 }
 0x258   :  { %3615 = vmatpush3.bf16.msra.mxu0 %v4058_v61 }
 0x259   :  { %3616 = vmatprep.subr.bf16.mxu0 %v4285_v3 }
 0x25c   :  { %3617 = vmatpush3.bf16.msra.mxu0 %v4059_v62 }
 0x25d   :  { %1616 = vmatprep.subr.bf16.mxu0 %v4070_v22  ;;  %v4110_v22 = vld [vmem:[%s5001_s17 + $0x10] sm:$0xff]  }
 0x312   :  { %v907_v26 = vpop.f32.mrb[4].mxu0 }
 0x313   :  { %v3842_v27 = vadd.f32 %v907_v26, %v585_v24  ;;  %v909_v28 = vpop.f32.mrb[5].mxu0  ;;  %v4071_v24 = vld [vmem:[%s4366_s12 + $0x10] ss:$8 sps:$4 sm:$0xff]   ;;  %v4074_v26 = vld [vmem:[%s4366_s12 + $0x20] ss:$8 sps:$4 sm:$0xff]  }
 0x314   :  { %v3843_v29 = vadd.f32 %v909_v28, %v589_v25  ;;  %v911_v30 = vpop.f32.mrb[6].mxu0  ;;  %v4076_v25 = vld [vmem:[%s4366_s12 + $0x24] ss:$8 sps:$4 sm:$0xff]   ;;  %v4077_v28 = vld [vmem:[%s4366_s12 + $0x30] ss:$8 sps:$4 sm:$0xff]  }
 0x315   :  { %v914_v31 = vmax.f32 %v3842_v27, 0.0  ;;  %v912_v32 = vpop.f32.mrb[7].mxu0  ;;  %v4079_v27 = vld [vmem:[%s4366_s12 + $0x34] ss:$8 sps:$4 sm:$0xff]   ;;  %v4080_v30 = vld [vmem:[%s4366_s12 + $0x40] ss:$8 sps:$4 sm:$0xff]  }
 0x316   :  { %v915_v33 = vmax.f32 %v3843_v29, 0.0  ;;  %v4082_v29 = vld [vmem:[%s4366_s12 + $0x44] ss:$8 sps:$4 sm:$0xff]   ;;  %v4083_v32 = vld [vmem:[%s4366_s12 + $0x50] ss:$8 sps:$4 sm:$0xff]  }
 0x317   :  { %v916_v36 = vpack.c.bf16 %v914_v31, %v914_v31  ;;  %v4085_v31 = vld [vmem:[%s4366_s12 + $0x54] ss:$8 sps:$4 sm:$0xff]  }
 0x318   :  { %v917_v34 = vpack.c.bf16 %v915_v33, %v915_v33  ;;  %v3272_v33 = vld [vmem:[%s4351_s24] ss:$0 sm:$0xff]  ;;  %s5009_s24 = sld [smem:[#allocation19_spill]] }
 0x31a   :  { %1154 = vmatprep.mubr.bf16.mxu1 %v917_v34 }
 0x31b   :  { %1155 = vmatmul.mubr.bf16.vlgmr.msra.gmra.mrb[12].mxu1 %v916_v36 }
 0x31c   :  { %3583 = vmatpush3.bf16.msra.mxu1 %v4044_v35  ;;  %3598 = vmatprep.mubr.msk.bf16.mxu1 %vm4286_vm0, %v4285_v3 }
 0x31d   :  { %3584 = vmatprep.subr.bf16.mxu1 %v4285_v3 }
 0x320   :  { %3585 = vmatpush3.bf16.msra.mxu1 %v4045_v37 }
 0x321   :  { %3586 = vmatprep.subr.bf16.mxu1 %v4285_v3 }
 0x324   :  { %3587 = vmatpush3.bf16.msra.mxu1 %v4046_v38 }
 0x325   :  { %3588 = vmatprep.subr.bf16.mxu1 %v4285_v3 }
 0x328   :  { %3589 = vmatpush3.bf16.msra.mxu1 %v4047_v39 }
 0x329   :  { %3590 = vmatprep.subr.bf16.mxu1 %v4285_v3 }
 0x32c   :  { %3591 = vmatpush3.bf16.msra.mxu1 %v4048_v40 }
 0x32d   :  { %3592 = vmatprep.subr.bf16.mxu1 %v4285_v3 }
 0x330   :  { %3593 = vmatpush3.bf16.msra.mxu1 %v4049_v41  ;;  %v4088_v41 = vld [vmem:[%s4366_s12 + $0x64] ss:$8 sps:$4 sm:$0xff]  }
 0x331   :  { %3594 = vmatprep.subr.bf16.mxu1 %v4285_v3 }
 0x334   :  { %3595 = vmatpush3.bf16.msra.mxu1 %v4050_v43  ;;  %v4086_v43 = vld [vmem:[%s4366_s12 + $0x60] ss:$8 sps:$4 sm:$0xff]  }
 0x335   :  { %3596 = vmatprep.subr.bf16.mxu1 %v4285_v3 }
 0x338   :  { %3597 = vmatpush3.bf16.msra.mxu1 %v4051_v45  ;;  %v4091_v45 = vld [vmem:[%s4366_s12 + $0x74] ss:$8 sps:$4 sm:$0xff]   ;;  %s5011_s12 = sld [smem:[#allocation21_spill]] }
 0x339   :  { %3622 = vmatprep.subr.bf16.mxu1 %v4285_v3 }
 0x3ee   :  { %v1156_v53 = vpop.f32.mrb[12].mxu1 }
 0x3ef   :  { %v1157_v54 = vadd.f32 %v1156_v53, %v955_v52  ;;  %v1158_v55 = vpop.f32.mrb[13].mxu1  ;;  %v4097_v52 = vld [vmem:[%s4997_s0 + $0x28] sm:$0xff]   ;;  %v3281_v53 = vld [vmem:[%s4998_s5] ss:$0 sm:$0xff] }
 0x3f0   :  { %v1160_v56 = vpop.f32.mrb[14].mxu1  ;;  %v1159_v13 = vadd.f32 %v1158_v55, %v959_v8  ;;  %v1524_v8 = vld [vmem:[%s5000_s13] sm:$0x3] }
 0x3f1   :  { %v1163_v57 = vmax.f32 %v1157_v54, 0.0  ;;  %v1161_v58 = vpop.f32.mrb[15].mxu1 }
 0x3f3   :  { %v1164_v59 = vpack.c.bf16 %v1163_v57, %v1163_v57 }
 0x3f5   :  { %3599 = vmatmul.mubr.bf16.vlgmr.msra.gmra.mrb[16].mxu1 %v1164_v59 }
 0x3f6   :  { %3638 = vmatprep.mubr.msk.bf16.mxu1 %vm4286_vm0, %v4285_v3  ;;  %3623 = vmatpush3.bf16.msra.mxu1 %v4060_v63  ;;  %v4098_v63 = vld [vmem:[%s4997_s0 + $0x30] sm:$0xff]  }
 0x3f7   :  { %3624 = vmatprep.subr.bf16.mxu1 %v4285_v3 }
 0x3fa   :  { %3625 = vmatpush3.bf16.msra.mxu1 %v4061_v0  ;;  %v4099_v0 = vld [vmem:[%s4997_s0 + $0x38] sm:$0xff]  }
 0x3fb   :  { %3626 = vmatprep.subr.bf16.mxu1 %v4285_v3 }
 0x3fe   :  { %3627 = vmatpush3.bf16.msra.mxu1 %v4062_v1  ;;  %v4100_v1 = vld [vmem:[%s4999_s9] sm:$0xff]  }
 0x3ff   :  { %3628 = vmatprep.subr.bf16.mxu1 %v4285_v3 }
 0x402   :  { %3629 = vmatpush3.bf16.msra.mxu1 %v4063_v4  ;;  %v4101_v4 = vld [vmem:[%s4999_s9 + $0x8] sm:$0xff]  }
 0x403   :  { %3630 = vmatprep.subr.bf16.mxu1 %v4285_v3 }
 0x406   :  { %3631 = vmatpush3.bf16.msra.mxu1 %v4064_v5  ;;  %v4102_v5 = vld [vmem:[%s4999_s9 + $0x10] sm:$0xff]  }
 0x407   :  { %3632 = vmatprep.subr.bf16.mxu1 %v4285_v3 }
 0x40a   :  { %3633 = vmatpush3.bf16.msra.mxu1 %v4065_v6  ;;  %v4103_v6 = vld [vmem:[%s4999_s9 + $0x18] sm:$0xff]  }
 0x40b   :  { %3634 = vmatprep.subr.bf16.mxu1 %v4285_v3 }
 0x40e   :  { %3635 = vmatpush3.bf16.msra.mxu1 %v4066_v19  ;;  %v4107_v19 = vld [vmem:[%s4999_s9 + $0x38] sm:$0xff]  }
 0x40f   :  { %3636 = vmatprep.subr.bf16.mxu1 %v4285_v3 }
 0x412   :  { %3637 = vmatpush3.bf16.msra.mxu1 %v4067_v20  ;;  %v4108_v20 = vld [vmem:[%s5001_s17] sm:$0xff]  }
 0x413   :  { %3642 = vmatprep.subr.bf16.mxu1 %v4285_v3 }
 0x4c8   :  { %v1270_v9 = vpop.f32.mrb[16].mxu1 }
 0x4c9   :  { %v1271_v10 = vadd.f32 %v3263_v7, %v1270_v9  ;;  %v3600_v11 = vpop.f32.mrb[17].mxu1  ;;  %v4104_v7 = vld [vmem:[%s4999_s9 + $0x20] sm:$0xff]   ;;  %v1529_v9 = vrot.slane %v1524_v8, %v4603_v42 }
 0x4ca   :  { %v1273_v12 = vpop.f32.mrb[18].mxu1 }
 0x4cb   :  { %v1276_v14 = vmax.f32 %v1271_v10, 0.0  ;;  %v3601_v15 = vpop.f32.mrb[19].mxu1 }
 0x4cd   :  { %v1277_v16 = vadd.f32 %v1276_v14, %v1159_v13 }
 0x4cf   :  { %v4688_v17 = vmax.f32 %v1277_v16, 0.0 }
 0x4d1   :  { %v1279_v18 = vpack.c.bf16 %v4688_v17, %v4688_v17 }
 0x4d3   :  { %3619 = vmatmul.mubr.bf16.vlgmr.msra.gmra.mrb[8].mxu0 %v1279_v18  ;;  %v4106_v18 = vld [vmem:[%s4999_s9 + $0x30] sm:$0xff]  }
 0x4d4   :  { %1648 = vmatprep.mubr.bf16.mxu0 %v4284_v2  ;;  %1617 = vmatpush1.bf16.msra.mxu0 %v4068_v21  ;;  %v4109_v21 = vld [vmem:[%s5001_s17 + $0x8] sm:$0xff]  }
 0x4d5   :  { %1618 = vmatprep.subr.bf16.mxu0 %v4073_v23  ;;  %v4111_v23 = vld [vmem:[%s5001_s17 + $0x18] sm:$0xff]  }
 0x4d8   :  { %1619 = vmatpush1.bf16.msra.mxu0 %v4071_v24  ;;  %v4112_v24 = vld [vmem:[%s5001_s17 + $0x20] sm:$0xff]  }
 0x4d9   :  { %1620 = vmatprep.subr.bf16.mxu0 %v4076_v25  ;;  %v4113_v25 = vld [vmem:[%s5001_s17 + $0x28] sm:$0xff]  }
 0x4dc   :  { %1621 = vmatpush1.bf16.msra.mxu0 %v4074_v26  ;;  %v3306_v26 = vld [vmem:[%s5002_s21] ss:$0 sm:$0xff] }
 0x4dd   :  { %1622 = vmatprep.subr.bf16.mxu0 %v4079_v27  ;;  %v1533_v27 = vrot.slane %v1524_v8, %v4606_v44  ;;  %v4144_v8 = vld [vmem:[%s5005_s3 + $0x20] sm:$0xff]  }
 0x4e0   :  { %1623 = vmatpush1.bf16.msra.mxu0 %v4077_v28 }
 0x4e1   :  { %1624 = vmatprep.subr.bf16.mxu0 %v4082_v29 }
 0x4e4   :  { %1625 = vmatpush1.bf16.msra.mxu0 %v4080_v30 }
 0x4e5   :  { %1626 = vmatprep.subr.bf16.mxu0 %v4085_v31 }
 0x4e8   :  { %1627 = vmatpush1.bf16.msra.mxu0 %v4083_v32 }
 0x4e9   :  { %1628 = vmatprep.subr.bf16.mxu0 %v4088_v41  ;;  %v4118_v41 = vld [vmem:[%s5003_s25 + $0x4] ss:$8 sps:$4 sm:$0xff]  }
 0x4ec   :  { %1629 = vmatpush1.bf16.msra.mxu0 %v4086_v43  ;;  %v4121_v43 = vld [vmem:[%s5003_s25 + $0x14] ss:$8 sps:$4 sm:$0xff]  }
 0x4ed   :  { %1630 = vmatprep.subr.bf16.mxu0 %v4091_v45  ;;  %v4119_v45 = vld [vmem:[%s5003_s25 + $0x10] ss:$8 sps:$4 sm:$0xff]  }
 0x4f0   :  { %1631 = vmatpush1.bf16.msra.mxu0 %v4089_v46  ;;  %v4124_v46 = vld [vmem:[%s5003_s25 + $0x24] ss:$8 sps:$4 sm:$0xff]  }
 0x4f1   :  { %3662 = vmatprep.subr.bf16.mxu0 %v4285_v3 }
 0x5a6   :  { %v1385_v34 = vpop.f32.mrb[8].mxu0 }
 0x5a7   :  { %v1386_v35 = vadd.f32 %v3272_v33, %v1385_v34  ;;  %v3620_v36 = vpop.f32.mrb[9].mxu0 }
 0x5a8   :  { %v1388_v37 = vpop.f32.mrb[10].mxu0 }
 0x5a9   :  { %v1391_v38 = vmax.f32 %v1386_v35, 0.0  ;;  %v3621_v39 = vpop.f32.mrb[11].mxu0 }
 0x5aa   :  { %v4115_v39 = vld [vmem:[%s5001_s17 + $0x38] sm:$0xff]  }
 0x5ab   :  { %v1392_v40 = vpack.c.bf16 %v1391_v38, %v1391_v38  ;;  %v4114_v38 = vld [vmem:[%s5001_s17 + $0x30] sm:$0xff]  }
 0x5ad   :  { %3639 = vmatmul.mubr.bf16.vlgmr.msra.gmra.mrb[20].mxu1 %v1392_v40  ;;  %v4116_v40 = vld [vmem:[%s5003_s25] ss:$8 sps:$4 sm:$0xff]  }
 0x5ae   :  { %3658 = vmatprep.mubr.msk.bf16.mxu1 %vm4286_vm0, %v4285_v3  ;;  %3643 = vmatpush3.bf16.msra.mxu1 %v4092_v47  ;;  %v4122_v47 = vld [vmem:[%s5003_s25 + $0x20] ss:$8 sps:$4 sm:$0xff]  }
 0x5af   :  { %3644 = vmatprep.subr.bf16.mxu1 %v4285_v3 }
 0x5b2   :  { %3645 = vmatpush3.bf16.msra.mxu1 %v4093_v48  ;;  %v4127_v48 = vld [vmem:[%s5003_s25 + $0x34] ss:$8 sps:$4 sm:$0xff]  }
 0x5b3   :  { %3646 = vmatprep.subr.bf16.mxu1 %v4285_v3 }
 0x5b6   :  { %3647 = vmatpush3.bf16.msra.mxu1 %v4094_v49  ;;  %v4125_v49 = vld [vmem:[%s5003_s25 + $0x30] ss:$8 sps:$4 sm:$0xff]  }
 0x5b7   :  { %3648 = vmatprep.subr.bf16.mxu1 %v4285_v3 }
 0x5ba   :  { %3649 = vmatpush3.bf16.msra.mxu1 %v4095_v50  ;;  %v4130_v50 = vld [vmem:[%s5003_s25 + $0x44] ss:$8 sps:$4 sm:$0xff]  }
 0x5bb   :  { %3650 = vmatprep.subr.bf16.mxu1 %v4285_v3 }
 0x5be   :  { %3651 = vmatpush3.bf16.msra.mxu1 %v4096_v51  ;;  %v4128_v51 = vld [vmem:[%s5003_s25 + $0x40] ss:$8 sps:$4 sm:$0xff]  }
 0x5bf   :  { %3652 = vmatprep.subr.bf16.mxu1 %v4285_v3 }
 0x5c2   :  { %3653 = vmatpush3.bf16.msra.mxu1 %v4097_v52  ;;  %v4133_v52 = vld [vmem:[%s5003_s25 + $0x54] ss:$8 sps:$4 sm:$0xff]  }
 0x5c3   :  { %3654 = vmatprep.subr.bf16.mxu1 %v4285_v3 }
 0x5c6   :  { %3655 = vmatpush3.bf16.msra.mxu1 %v4098_v63  ;;  %v4134_v63 = vld [vmem:[%s5003_s25 + $0x60] ss:$8 sps:$4 sm:$0xff]  }
 0x5c7   :  { %3656 = vmatprep.subr.bf16.mxu1 %v4285_v3 }
 0x5ca   :  { %3657 = vmatpush3.bf16.msra.mxu1 %v4099_v0  ;;  %v4139_v0 = vld [vmem:[%s5003_s25 + $0x74] ss:$8 sps:$4 sm:$0xff]  }
 0x5cb   :  { %3682 = vmatprep.subr.bf16.mxu1 %v4285_v3 }
 0x680   :  { %v1498_v54 = vpop.f32.mrb[20].mxu1 }
 0x681   :  { %v1499_v55 = vadd.f32 %v3281_v53, %v1498_v54  ;;  %v3640_v56 = vpop.f32.mrb[21].mxu1  ;;  %v4131_v53 = vld [vmem:[%s5003_s25 + $0x50] ss:$8 sps:$4 sm:$0xff]   ;;  %v3315_v54 = vld [vmem:[%s5004_s29] ss:$0 sm:$0xff] }
 0x682   :  { %v1501_v57 = vpop.f32.mrb[22].mxu1 }
 0x683   :  { %v1504_v58 = vmax.f32 %v1499_v55, 0.0  ;;  %v3641_v59 = vpop.f32.mrb[23].mxu1 }
 0x685   :  { %v1505_v60 = vadd.f32 %v1504_v58, %v4688_v17  ;;  %v4105_v17 = vld [vmem:[%s4999_s9 + $0x28] sm:$0xff]  }
 0x687   :  { %v1506_v61 = vmax.f32 %v1505_v60, 0.0 }
 0x689   :  { %v1507_v62 = vpack.c.bf16 %v1506_v61, %v1506_v61 }
 0x68b   :  { %1649 = vmatmul.mubr.bf16.vlgmr.msra.gmra.mrb[12].mxu0 %v1507_v62  ;;  %v4136_v62 = vld [vmem:[%s5003_s25 + $0x64] ss:$8 sps:$4 sm:$0xff]  }
 0x68c   :  { %3678 = vmatprep.mubr.msk.bf16.mxu0 %vm4286_vm0, %v4285_v3  ;;  %3663 = vmatpush3.bf16.msra.mxu0 %v4100_v1  ;;  %v4137_v1 = vld [vmem:[%s5003_s25 + $0x70] ss:$8 sps:$4 sm:$0xff]  }
 0x68d   :  { %3664 = vmatprep.subr.bf16.mxu0 %v4285_v3 }
 0x690   :  { %3665 = vmatpush3.bf16.msra.mxu0 %v4101_v4  ;;  %v4140_v4 = vld [vmem:[%s5005_s3] sm:$0xff]  }
 0x691   :  { %3666 = vmatprep.subr.bf16.mxu0 %v4285_v3 }
 0x694   :  { %3667 = vmatpush3.bf16.msra.mxu0 %v4102_v5  ;;  %v4141_v5 = vld [vmem:[%s5005_s3 + $0x8] sm:$0xff]  }
 0x695   :  { %3668 = vmatprep.subr.bf16.mxu0 %v4285_v3 }
 0x698   :  { %3669 = vmatpush3.bf16.msra.mxu0 %v4103_v6  ;;  %v4142_v6 = vld [vmem:[%s5005_s3 + $0x10] sm:$0xff]  }
 0x699   :  { %3670 = vmatprep.subr.bf16.mxu0 %v4285_v3 }
 0x69c   :  { %3671 = vmatpush3.bf16.msra.mxu0 %v4104_v7  ;;  %v4143_v7 = vld [vmem:[%s5005_s3 + $0x18] sm:$0xff]  }
 0x69d   :  { %3672 = vmatprep.subr.bf16.mxu0 %v4285_v3 }
 0x6a0   :  { %3673 = vmatpush3.bf16.msra.mxu0 %v4105_v17 }
 0x6a1   :  { %3674 = vmatprep.subr.bf16.mxu0 %v4285_v3 }
 0x6a4   :  { %3675 = vmatpush3.bf16.msra.mxu0 %v4106_v18 }
 0x6a5   :  { %3676 = vmatprep.subr.bf16.mxu0 %v4285_v3 }
 0x6a8   :  { %3677 = vmatpush3.bf16.msra.mxu0 %v4107_v19 }
 0x6a9   :  { %2110 = vmatprep.subr.bf16.mxu0 %v4118_v41  ;;  %v4158_v41 = vld [vmem:[%s5009_s24 + $0x10] sm:$0xff]  }
 0x75e   :  { %v1650_v10 = vpop.f32.mrb[12].mxu0 }
 0x75f   :  { %v1651_v11 = vadd.f32 %v1650_v10, %v1529_v9  ;;  %v1652_v12 = vpop.f32.mrb[13].mxu0  ;;  %v4145_v9 = vld [vmem:[%s5005_s3 + $0x28] sm:$0xff]   ;;  %v3324_v10 = vld [vmem:[%s5006_s8] ss:$0 sm:$0xff] }
 0x760   :  { %v1654_v13 = vpop.f32.mrb[14].mxu0  ;;  %v1653_v32 = vadd.f32 %v1652_v12, %v1533_v27  ;;  %v2018_v27 = vld [vmem:[%s5008_s19] sm:$0x3] }
 0x761   :  { %v1657_v14 = vmax.f32 %v1651_v11, 0.0  ;;  %v1655_v15 = vpop.f32.mrb[15].mxu0 }
 0x763   :  { %v1658_v16 = vpack.c.bf16 %v1657_v14, %v1657_v14 }
 0x765   :  { %3659 = vmatmul.mubr.bf16.vlgmr.msra.gmra.mrb[24].mxu1 %v1658_v16 }
 0x766   :  { %3698 = vmatprep.mubr.msk.bf16.mxu1 %vm4286_vm0, %v4285_v3  ;;  %3683 = vmatpush3.bf16.msra.mxu1 %v4108_v20  ;;  %v4146_v20 = vld [vmem:[%s5005_s3 + $0x30] sm:$0xff]  }
 0x767   :  { %3684 = vmatprep.subr.bf16.mxu1 %v4285_v3 }
 0x76a   :  { %3685 = vmatpush3.bf16.msra.mxu1 %v4109_v21  ;;  %v4147_v21 = vld [vmem:[%s5005_s3 + $0x38] sm:$0xff]  }
 0x76b   :  { %3686 = vmatprep.subr.bf16.mxu1 %v4285_v3 }
 0x76e   :  { %3687 = vmatpush3.bf16.msra.mxu1 %v4110_v22  ;;  %v4148_v22 = vld [vmem:[%s5007_s14] sm:$0xff]  }
 0x76f   :  { %3688 = vmatprep.subr.bf16.mxu1 %v4285_v3 }
 0x772   :  { %3689 = vmatpush3.bf16.msra.mxu1 %v4111_v23  ;;  %v4149_v23 = vld [vmem:[%s5007_s14 + $0x8] sm:$0xff]  }
 0x773   :  { %3690 = vmatprep.subr.bf16.mxu1 %v4285_v3 }
 0x776   :  { %3691 = vmatpush3.bf16.msra.mxu1 %v4112_v24  ;;  %v4150_v24 = vld [vmem:[%s5007_s14 + $0x10] sm:$0xff]  }
 0x777   :  { %3692 = vmatprep.subr.bf16.mxu1 %v4285_v3 }
 0x77a   :  { %3693 = vmatpush3.bf16.msra.mxu1 %v4113_v25  ;;  %v4151_v25 = vld [vmem:[%s5007_s14 + $0x18] sm:$0xff]  }
 0x77b   :  { %3694 = vmatprep.subr.bf16.mxu1 %v4285_v3 }
 0x77e   :  { %3695 = vmatpush3.bf16.msra.mxu1 %v4114_v38  ;;  %v4155_v38 = vld [vmem:[%s5007_s14 + $0x38] sm:$0xff]  }
 0x77f   :  { %3696 = vmatprep.subr.bf16.mxu1 %v4285_v3 }
 0x782   :  { %3697 = vmatpush3.bf16.msra.mxu1 %v4115_v39  ;;  %v4156_v39 = vld [vmem:[%s5009_s24] sm:$0xff]  }
 0x783   :  { %3702 = vmatprep.subr.bf16.mxu1 %v4285_v3 }
 0x838   :  { %v1764_v28 = vpop.f32.mrb[24].mxu1 }
 0x839   :  { %v1765_v29 = vadd.f32 %v3306_v26, %v1764_v28  ;;  %v3660_v30 = vpop.f32.mrb[25].mxu1  ;;  %v4152_v26 = vld [vmem:[%s5007_s14 + $0x20] sm:$0xff]   ;;  %v2023_v28 = vrot.slane %v2018_v27, %v4603_v42 }
 0x83a   :  { %v1767_v31 = vpop.f32.mrb[26].mxu1 }
 0x83b   :  { %v1770_v33 = vmax.f32 %v1765_v29, 0.0  ;;  %v3661_v34 = vpop.f32.mrb[27].mxu1 }
 0x83d   :  { %v1771_v35 = vadd.f32 %v1770_v33, %v1653_v32 }
 0x83f   :  { %v4770_v36 = vmax.f32 %v1771_v35, 0.0 }
 0x841   :  { %v1773_v37 = vpack.c.bf16 %v4770_v36, %v4770_v36 }
 0x843   :  { %3679 = vmatmul.mubr.bf16.vlgmr.msra.gmra.mrb[16].mxu0 %v1773_v37  ;;  %v4154_v37 = vld [vmem:[%s5007_s14 + $0x30] sm:$0xff]  }
 0x844   :  { %2142 = vmatprep.mubr.bf16.mxu0 %v4284_v2  ;;  %2111 = vmatpush1.bf16.msra.mxu0 %v4116_v40  ;;  %v4157_v40 = vld [vmem:[%s5009_s24 + $0x8] sm:$0xff]  }
 0x845   :  { %2112 = vmatprep.subr.bf16.mxu0 %v4121_v43  ;;  %v4159_v43 = vld [vmem:[%s5009_s24 + $0x18] sm:$0xff]  }
 0x848   :  { %2113 = vmatpush1.bf16.msra.mxu0 %v4119_v45  ;;  %v4160_v45 = vld [vmem:[%s5009_s24 + $0x20] sm:$0xff]  }
 0x849   :  { %2114 = vmatprep.subr.bf16.mxu0 %v4124_v46  ;;  %v4161_v46 = vld [vmem:[%s5009_s24 + $0x28] sm:$0xff]  }
 0x84c   :  { %2115 = vmatpush1.bf16.msra.mxu0 %v4122_v47  ;;  %v3349_v47 = vld [vmem:[%s5010_s30] ss:$0 sm:$0xff] }
 0x84d   :  { %2116 = vmatprep.subr.bf16.mxu0 %v4127_v48  ;;  %v2027_v48 = vrot.slane %v2018_v27, %v4606_v44  ;;  %v4193_v27 = vld [vmem:[%s5013_s1 + $0x28] sm:$0xff]  }
 0x850   :  { %2117 = vmatpush1.bf16.msra.mxu0 %v4125_v49 }
 0x851   :  { %2118 = vmatprep.subr.bf16.mxu0 %v4130_v50 }
 0x854   :  { %2119 = vmatpush1.bf16.msra.mxu0 %v4128_v51 }
 0x855   :  { %2120 = vmatprep.subr.bf16.mxu0 %v4133_v52 }
 0x858   :  { %2121 = vmatpush1.bf16.msra.mxu0 %v4131_v53 }
 0x859   :  { %2122 = vmatprep.subr.bf16.mxu0 %v4136_v62  ;;  %v4166_v62 = vld [vmem:[%s5011_s12 + $0x4] ss:$8 sps:$4 sm:$0xff]  }
 0x85c   :  { %2123 = vmatpush1.bf16.msra.mxu0 %v4134_v63  ;;  %v4169_v63 = vld [vmem:[%s5011_s12 + $0x14] ss:$8 sps:$4 sm:$0xff]  }
 0x85d   :  { %2124 = vmatprep.subr.bf16.mxu0 %v4139_v0  ;;  %v4172_v0 = vld [vmem:[%s5011_s12 + $0x24] ss:$8 sps:$4 sm:$0xff]  }
 0x860   :  { %2125 = vmatpush1.bf16.msra.mxu0 %v4137_v1  ;;  %v4170_v1 = vld [vmem:[%s5011_s12 + $0x20] ss:$8 sps:$4 sm:$0xff]  }
 0x861   :  { %3722 = vmatprep.subr.bf16.mxu0 %v4285_v3 }
 0x916   :  { %v1879_v55 = vpop.f32.mrb[16].mxu0 }
 0x917   :  { %v1880_v56 = vadd.f32 %v3315_v54, %v1879_v55  ;;  %v3680_v57 = vpop.f32.mrb[17].mxu0 }
 0x918   :  { %v1882_v58 = vpop.f32.mrb[18].mxu0 }
 0x919   :  { %v1885_v59 = vmax.f32 %v1880_v56, 0.0  ;;  %v3681_v60 = vpop.f32.mrb[19].mxu0 }
 0x91a   :  { %v4163_v60 = vld [vmem:[%s5009_s24 + $0x38] sm:$0xff]  }
 0x91b   :  { %v1886_v61 = vpack.c.bf16 %v1885_v59, %v1885_v59  ;;  %v4162_v59 = vld [vmem:[%s5009_s24 + $0x30] sm:$0xff]  }
 0x91d   :  { %3699 = vmatmul.mubr.bf16.vlgmr.msra.gmra.mrb[28].mxu1 %v1886_v61  ;;  %v4164_v61 = vld [vmem:[%s5011_s12] ss:$8 sps:$4 sm:$0xff]  }
 0x91e   :  { %3718 = vmatprep.mubr.msk.bf16.mxu1 %vm4286_vm0, %v4285_v3  ;;  %3703 = vmatpush3.bf16.msra.mxu1 %v4140_v4  ;;  %v4175_v4 = vld [vmem:[%s5011_s12 + $0x34] ss:$8 sps:$4 sm:$0xff]  }
 0x91f   :  { %3704 = vmatprep.subr.bf16.mxu1 %v4285_v3 }
 0x922   :  { %3705 = vmatpush3.bf16.msra.mxu1 %v4141_v5  ;;  %v4173_v5 = vld [vmem:[%s5011_s12 + $0x30] ss:$8 sps:$4 sm:$0xff]  }
 0x923   :  { %3706 = vmatprep.subr.bf16.mxu1 %v4285_v3 }
 0x926   :  { %3707 = vmatpush3.bf16.msra.mxu1 %v4142_v6  ;;  %v4178_v6 = vld [vmem:[%s5011_s12 + $0x44] ss:$8 sps:$4 sm:$0xff]  }
 0x927   :  { %3708 = vmatprep.subr.bf16.mxu1 %v4285_v3 }
 0x92a   :  { %3709 = vmatpush3.bf16.msra.mxu1 %v4143_v7  ;;  %v4176_v7 = vld [vmem:[%s5011_s12 + $0x40] ss:$8 sps:$4 sm:$0xff]  }
 0x92b   :  { %3710 = vmatprep.subr.bf16.mxu1 %v4285_v3 }
 0x92e   :  { %3711 = vmatpush3.bf16.msra.mxu1 %v4144_v8  ;;  %v4181_v8 = vld [vmem:[%s5011_s12 + $0x54] ss:$8 sps:$4 sm:$0xff]  }
 0x92f   :  { %3712 = vmatprep.subr.bf16.mxu1 %v4285_v3 }
 0x932   :  { %3713 = vmatpush3.bf16.msra.mxu1 %v4145_v9  ;;  %v4179_v9 = vld [vmem:[%s5011_s12 + $0x50] ss:$8 sps:$4 sm:$0xff]  }
 0x933   :  { %3714 = vmatprep.subr.bf16.mxu1 %v4285_v3 }
 0x936   :  { %3715 = vmatpush3.bf16.msra.mxu1 %v4146_v20  ;;  %v4187_v20 = vld [vmem:[%s5011_s12 + $0x74] ss:$8 sps:$4 sm:$0xff]  }
 0x937   :  { %3716 = vmatprep.subr.bf16.mxu1 %v4285_v3 }
 0x93a   :  { %3717 = vmatpush3.bf16.msra.mxu1 %v4147_v21  ;;  %v4185_v21 = vld [vmem:[%s5011_s12 + $0x70] ss:$8 sps:$4 sm:$0xff]  }
 0x93b   :  { %3742 = vmatprep.subr.bf16.mxu1 %v4285_v3 }
 0x9f0   :  { %v1992_v11 = vpop.f32.mrb[28].mxu1 }
 0x9f1   :  { %v1993_v12 = vadd.f32 %v3324_v10, %v1992_v11  ;;  %v3700_v13 = vpop.f32.mrb[29].mxu1  ;;  %v3358_v10 = vld [vmem:[%s5012_s28] ss:$0 sm:$0xff] }
 0x9f2   :  { %v1995_v14 = vpop.f32.mrb[30].mxu1 }
 0x9f3   :  { %v1998_v15 = vmax.f32 %v1993_v12, 0.0  ;;  %v3701_v16 = vpop.f32.mrb[31].mxu1 }
 0x9f5   :  { %v1999_v17 = vadd.f32 %v1998_v15, %v4770_v36  ;;  %v4153_v36 = vld [vmem:[%s5007_s14 + $0x28] sm:$0xff]  }
 0x9f7   :  { %v2000_v18 = vmax.f32 %v1999_v17, 0.0 }
 0x9f9   :  { %v2001_v19 = vpack.c.bf16 %v2000_v18, %v2000_v18  ;;  %v4184_v18 = vld [vmem:[%s5011_s12 + $0x64] ss:$8 sps:$4 sm:$0xff]  }
 0x9fb   :  { %2143 = vmatmul.mubr.bf16.vlgmr.msra.gmra.mrb[20].mxu0 %v2001_v19  ;;  %v4182_v19 = vld [vmem:[%s5011_s12 + $0x60] ss:$8 sps:$4 sm:$0xff]  }
 0x9fc   :  { %3738 = vmatprep.mubr.msk.bf16.mxu0 %vm4286_vm0, %v4285_v3  ;;  %3723 = vmatpush3.bf16.msra.mxu0 %v4148_v22  ;;  %v4188_v22 = vld [vmem:[%s5013_s1] sm:$0xff]  }
 0x9fd   :  { %3724 = vmatprep.subr.bf16.mxu0 %v4285_v3 }
 0xa00   :  { %3725 = vmatpush3.bf16.msra.mxu0 %v4149_v23  ;;  %v4189_v23 = vld [vmem:[%s5013_s1 + $0x8] sm:$0xff]  }
 0xa01   :  { %3726 = vmatprep.subr.bf16.mxu0 %v4285_v3 }
 0xa04   :  { %3727 = vmatpush3.bf16.msra.mxu0 %v4150_v24  ;;  %v4190_v24 = vld [vmem:[%s5013_s1 + $0x10] sm:$0xff]  }
 0xa05   :  { %3728 = vmatprep.subr.bf16.mxu0 %v4285_v3 }
 0xa08   :  { %3729 = vmatpush3.bf16.msra.mxu0 %v4151_v25  ;;  %v4191_v25 = vld [vmem:[%s5013_s1 + $0x18] sm:$0xff]  }
 0xa09   :  { %3730 = vmatprep.subr.bf16.mxu0 %v4285_v3 }
 0xa0c   :  { %3731 = vmatpush3.bf16.msra.mxu0 %v4152_v26  ;;  %v4192_v26 = vld [vmem:[%s5013_s1 + $0x20] sm:$0xff]  }
 0xa0d   :  { %3732 = vmatprep.subr.bf16.mxu0 %v4285_v3 }
 0xa10   :  { %3733 = vmatpush3.bf16.msra.mxu0 %v4153_v36 }
 0xa11   :  { %3734 = vmatprep.subr.bf16.mxu0 %v4285_v3 }
 0xa14   :  { %3735 = vmatpush3.bf16.msra.mxu0 %v4154_v37 }
 0xa15   :  { %3736 = vmatprep.subr.bf16.mxu0 %v4285_v3 }
 0xa18   :  { %3737 = vmatpush3.bf16.msra.mxu0 %v4155_v38  ;;  %v4194_v38 = vld [vmem:[%s5013_s1 + $0x30] sm:$0xff]  }
 0xa19   :  { %2604 = vmatprep.subr.bf16.mxu0 %v4166_v62  ;;  %v4208_v62 = vld [vmem:[%s5017_s11 + $0x20] sm:$0xff]  }
 0xace   :  { %v2144_v29 = vpop.f32.mrb[20].mxu0 }
 0xacf   :  { %v2145_v30 = vadd.f32 %v2144_v29, %v2023_v28  ;;  %v2146_v31 = vpop.f32.mrb[21].mxu0  ;;  %v3367_v28 = vld [vmem:[%s5014_s2] ss:$0 sm:$0xff] }
 0xad0   :  { %v2148_v32 = vpop.f32.mrb[22].mxu0  ;;  %v2147_v53 = vadd.f32 %v2146_v31, %v2027_v48 }
 0xad1   :  { %v2151_v33 = vmax.f32 %v2145_v30, 0.0  ;;  %v2149_v34 = vpop.f32.mrb[23].mxu0 }
 0xad3   :  { %v2152_v35 = vpack.c.bf16 %v2151_v33, %v2151_v33 }
 0xad5   :  { %3719 = vmatmul.mubr.bf16.vlgmr.msra.gmra.mrb[32].mxu1 %v2152_v35 }
 0xad6   :  { %3758 = vmatprep.mubr.msk.bf16.mxu1 %vm4286_vm0, %v4285_v3  ;;  %3743 = vmatpush3.bf16.msra.mxu1 %v4156_v39  ;;  %v4195_v39 = vld [vmem:[%s5013_s1 + $0x38] sm:$0xff]  }
 0xad7   :  { %3744 = vmatprep.subr.bf16.mxu1 %v4285_v3 }
 0xada   :  { %3745 = vmatpush3.bf16.msra.mxu1 %v4157_v40  ;;  %v4196_v40 = vld [vmem:[%s5015_s7] sm:$0xff]  }
 0xadb   :  { %3746 = vmatprep.subr.bf16.mxu1 %v4285_v3 }
 0xade   :  { %3747 = vmatpush3.bf16.msra.mxu1 %v4158_v41  ;;  %v4197_v41 = vld [vmem:[%s5015_s7 + $0x8] sm:$0xff]  }
 0xadf   :  { %3748 = vmatprep.subr.bf16.mxu1 %v4285_v3 }
 0xae2   :  { %3749 = vmatpush3.bf16.msra.mxu1 %v4159_v43  ;;  %v4198_v43 = vld [vmem:[%s5015_s7 + $0x10] sm:$0xff]  }
 0xae3   :  { %3750 = vmatprep.subr.bf16.mxu1 %v4285_v3 }
 0xae6   :  { %3751 = vmatpush3.bf16.msra.mxu1 %v4160_v45  ;;  %v4199_v45 = vld [vmem:[%s5015_s7 + $0x18] sm:$0xff]  }
 0xae7   :  { %3752 = vmatprep.subr.bf16.mxu1 %v4285_v3 }
 0xaea   :  { %3753 = vmatpush3.bf16.msra.mxu1 %v4161_v46  ;;  %v4200_v46 = vld [vmem:[%s5015_s7 + $0x20] sm:$0xff]  }
 0xaeb   :  { %3754 = vmatprep.subr.bf16.mxu1 %v4285_v3 }
 0xaee   :  { %3755 = vmatpush3.bf16.msra.mxu1 %v4162_v59  ;;  %v4205_v59 = vld [vmem:[%s5017_s11 + $0x8] sm:$0xff]  }
 0xaef   :  { %3756 = vmatprep.subr.bf16.mxu1 %v4285_v3 }
 0xaf2   :  { %3757 = vmatpush3.bf16.msra.mxu1 %v4163_v60  ;;  %v4206_v60 = vld [vmem:[%s5017_s11 + $0x10] sm:$0xff]  }
 0xaf3   :  { %3762 = vmatprep.subr.bf16.mxu1 %v4285_v3 }
 0xba8   :  { %v2258_v49 = vpop.f32.mrb[32].mxu1 }
 0xba9   :  { %v2259_v50 = vadd.f32 %v3349_v47, %v2258_v49  ;;  %v3720_v51 = vpop.f32.mrb[33].mxu1  ;;  %v2512_v47 = vld [vmem:[%s5016_s10] sm:$0x3] }
 0xbaa   :  { %v2261_v52 = vpop.f32.mrb[34].mxu1  ;;  %v2517_v48 = vrot.slane %v2512_v47, %v4603_v42  ;;  %v4202_v42 = vld [vmem:[%s5015_s7 + $0x30] sm:$0xff]  }
 0xbab   :  { %v2264_v54 = vmax.f32 %v2259_v50, 0.0  ;;  %v3721_v55 = vpop.f32.mrb[35].mxu1 }
 0xbad   :  { %v2265_v56 = vadd.f32 %v2264_v54, %v2147_v53 }
 0xbaf   :  { %v4852_v57 = vmax.f32 %v2265_v56, 0.0  ;;  %v4201_v56 = vld [vmem:[%s5015_s7 + $0x28] sm:$0xff]  }
 0xbb1   :  { %v2267_v58 = vpack.c.bf16 %v4852_v57, %v4852_v57 }
 0xbb3   :  { %3739 = vmatmul.mubr.bf16.vlgmr.msra.gmra.mrb[24].mxu0 %v2267_v58  ;;  %v4204_v58 = vld [vmem:[%s5017_s11] sm:$0xff]  }
 0xbb4   :  { %2636 = vmatprep.mubr.bf16.mxu0 %v4284_v2  ;;  %2605 = vmatpush1.bf16.msra.mxu0 %v4164_v61  ;;  %v4167_v2 = vld [vmem:[%s5011_s12 + $0x10] ss:$8 sps:$4 sm:$0xff]  }
 0xbb5   :  { %2606 = vmatprep.subr.bf16.mxu0 %v4169_v63  ;;  %v4207_v61 = vld [vmem:[%s5017_s11 + $0x18] sm:$0xff]   ;;  %v4209_v63 = vld [vmem:[%s5017_s11 + $0x28] sm:$0xff]  }
 0xbb8   :  { %2607 = vmatpush1.bf16.msra.mxu0 %v4167_v2  ;;  %v3392_v2 = vld [vmem:[%s5018_s15] ss:$0 sm:$0xff] }
 0xbb9   :  { %2608 = vmatprep.subr.bf16.mxu0 %v4172_v0  ;;  %v2521_v0 = vrot.slane %v2512_v47, %v4606_v44  ;;  %v4210_v44 = vld [vmem:[%s5017_s11 + $0x30] sm:$0xff]  }
 0xbbc   :  { %2609 = vmatpush1.bf16.msra.mxu0 %v4170_v1 }
 0xbbd   :  { %2610 = vmatprep.subr.bf16.mxu0 %v4175_v4 }
 0xbc0   :  { %2611 = vmatpush1.bf16.msra.mxu0 %v4173_v5 }
 0xbc1   :  { %2612 = vmatprep.subr.bf16.mxu0 %v4178_v6 }
 0xbc4   :  { %2613 = vmatpush1.bf16.msra.mxu0 %v4176_v7 }
 0xbc5   :  { %2614 = vmatprep.subr.bf16.mxu0 %v4181_v8 }
 0xbc8   :  { %2615 = vmatpush1.bf16.msra.mxu0 %v4179_v9 }
 0xbc9   :  { %2616 = vmatprep.subr.bf16.mxu0 %v4184_v18  ;;  %v4216_v18 = vld [vmem:[%s4486_s6 + $0x20] sm:$0xff]  }
 0xbcc   :  { %2617 = vmatpush1.bf16.msra.mxu0 %v4182_v19  ;;  %v3401_v19 = vld [vmem:[%s5019_s16] ss:$0 sm:$0xff] }
 0xbcd   :  { %2618 = vmatprep.subr.bf16.mxu0 %v4187_v20 }
 0xbd0   :  { %2619 = vmatpush1.bf16.msra.mxu0 %v4185_v21 }
 0xbd1   :  { %3782 = vmatprep.subr.bf16.mxu0 %v4285_v3 }
 0xc86   :  { %v2373_v11 = vpop.f32.mrb[24].mxu0 }
 0xc87   :  { %v2374_v12 = vadd.f32 %v3358_v10, %v2373_v11  ;;  %v3740_v13 = vpop.f32.mrb[25].mxu0 }
 0xc88   :  { %v2376_v14 = vpop.f32.mrb[26].mxu0  ;;  %v4211_v13 = vld [vmem:[%s5017_s11 + $0x38] sm:$0xff]  }
 0xc89   :  { %v2379_v15 = vmax.f32 %v2374_v12, 0.0  ;;  %v3741_v16 = vpop.f32.mrb[27].mxu0  ;;  %v4212_v14 = vld [vmem:[%s4486_s6] sm:$0xff]  }
 0xc8a   :  { %v4214_v16 = vld [vmem:[%s4486_s6 + $0x10] sm:$0xff]  }
 0xc8b   :  { %v2380_v17 = vpack.c.bf16 %v2379_v15, %v2379_v15  ;;  %v4213_v15 = vld [vmem:[%s4486_s6 + $0x8] sm:$0xff]  }
 0xc8d   :  { %3759 = vmatmul.mubr.bf16.vlgmr.msra.gmra.mrb[36].mxu1 %v2380_v17  ;;  %v4215_v17 = vld [vmem:[%s4486_s6 + $0x18] sm:$0xff]  }
 0xc8e   :  { %3778 = vmatprep.mubr.msk.bf16.mxu1 %vm4286_vm0, %v4285_v3  ;;  %3763 = vmatpush3.bf16.msra.mxu1 %v4188_v22 }
 0xc8f   :  { %3764 = vmatprep.subr.bf16.mxu1 %v4285_v3 }
 0xc92   :  { %3765 = vmatpush3.bf16.msra.mxu1 %v4189_v23 }
 0xc93   :  { %3766 = vmatprep.subr.bf16.mxu1 %v4285_v3 }
 0xc96   :  { %3767 = vmatpush3.bf16.msra.mxu1 %v4190_v24 }
 0xc97   :  { %3768 = vmatprep.subr.bf16.mxu1 %v4285_v3 }
 0xc9a   :  { %3769 = vmatpush3.bf16.msra.mxu1 %v4191_v25 }
 0xc9b   :  { %3770 = vmatprep.subr.bf16.mxu1 %v4285_v3 }
 0xc9e   :  { %3771 = vmatpush3.bf16.msra.mxu1 %v4192_v26 }
 0xc9f   :  { %3772 = vmatprep.subr.bf16.mxu1 %v4285_v3 }
 0xca2   :  { %3773 = vmatpush3.bf16.msra.mxu1 %v4193_v27  ;;  %v4217_v27 = vld [vmem:[%s4486_s6 + $0x28] sm:$0xff]  }
 0xca3   :  { %3774 = vmatprep.subr.bf16.mxu1 %v4285_v3 }
 0xca6   :  { %3775 = vmatpush3.bf16.msra.mxu1 %v4194_v38 }
 0xca7   :  { %3776 = vmatprep.subr.bf16.mxu1 %v4285_v3 }
 0xcaa   :  { %3777 = vmatpush3.bf16.msra.mxu1 %v4195_v39 }
 0xcab   :  { %3802 = vmatprep.subr.bf16.mxu1 %v4285_v3 }
 0xd60   :  { %v2486_v29 = vpop.f32.mrb[36].mxu1 }
 0xd61   :  { %v2487_v30 = vadd.f32 %v3367_v28, %v2486_v29  ;;  %v3760_v31 = vpop.f32.mrb[37].mxu1  ;;  %v4218_v28 = vld [vmem:[%s4486_s6 + $0x30] sm:$0xff]   ;;  %v4219_v29 = vld [vmem:[%s4486_s6 + $0x38] sm:$0xff]   ;;  %s4220_s6 = scalar_lea.vmem %s3109_s22, 128 }
 0xd62   :  { %v2489_v32 = vpop.f32.mrb[38].mxu1  ;;  %p4221_p0 = scmp.ne.s32.totalorder %s3109_s22, %s4220_s6  ;;  %p4226_p2 = scmp.lt.s32.totalorder %s4220_s6, %s4220_s6 }
 0xd63   :  { %v2492_v33 = vmax.f32 %v2487_v30, 0.0  ;;  %v3761_v34 = vpop.f32.mrb[39].mxu1  ;;  %v3410_v30 = vld [vmem:[%s4481_s4] ss:$0 sm:$0xff] }
 0xd64   :  { %p4227_p3 = por %p4226_p2, %p4225_p1 }
 0xd65   :  { %v2493_v35 = vadd.f32 %v2492_v33, %v4852_v57  ;;  %v4203_v57 = vld [vmem:[%s5015_s7 + $0x38] sm:$0xff]  }
 0xd66   :  { %p4228_p4 = pnand %p4227_p3, %p4221_p0 }
 0xd67   :  { %v2494_v36 = vmax.f32 %v2493_v35, 0.0 }
 0xd69   :  { %v2495_v37 = vpack.c.bf16 %v2494_v36, %v2494_v36 }
 0xd6b   :  { %2637 = vmatmul.mubr.bf16.vlgmr.msra.gmra.mrb[28].mxu0 %v2495_v37 }
 0xd6c   :  { %3798 = vmatprep.mubr.msk.bf16.mxu0 %vm4286_vm0, %v4285_v3  ;;  %3783 = vmatpush3.bf16.msra.mxu0 %v4196_v40  ;;  %v3419_v40 = vld [vmem:[%s4491_s20] ss:$0 sm:$0xff] }
 0xd6d   :  { %3784 = vmatprep.subr.bf16.mxu0 %v4285_v3 }
 0xd70   :  { %3785 = vmatpush3.bf16.msra.mxu0 %v4197_v41 }
 0xd71   :  { %3786 = vmatprep.subr.bf16.mxu0 %v4285_v3 }
 0xd74   :  { %3787 = vmatpush3.bf16.msra.mxu0 %v4198_v43 }
 0xd75   :  { %3788 = vmatprep.subr.bf16.mxu0 %v4285_v3 }
 0xd78   :  { %3789 = vmatpush3.bf16.msra.mxu0 %v4199_v45 }
 0xd79   :  { %3790 = vmatprep.subr.bf16.mxu0 %v4285_v3 }
 0xd7c   :  { %3791 = vmatpush3.bf16.msra.mxu0 %v4200_v46 }
 0xd7d   :  { %3792 = vmatprep.subr.bf16.mxu0 %v4285_v3 }
 0xd80   :  { %3793 = vmatpush3.bf16.msra.mxu0 %v4201_v56 }
 0xd81   :  { %3794 = vmatprep.subr.bf16.mxu0 %v4285_v3 }
 0xd84   :  { %3795 = vmatpush3.bf16.msra.mxu0 %v4202_v42 }
 0xd85   :  { %3796 = vmatprep.subr.bf16.mxu0 %v4285_v3 }
 0xd88   :  { %3797 = vmatpush3.bf16.msra.mxu0 %v4203_v57 }
 0xd89   :  { %3822 = vmatprep.subr.bf16.mxu0 %v4285_v3 }
 0xe3e   :  { %v2638_v49 = vpop.f32.mrb[28].mxu0 }
 0xe3f   :  { %v2639_v50 = vadd.f32 %v2638_v49, %v2517_v48  ;;  %v2640_v51 = vpop.f32.mrb[29].mxu0 }
 0xe40   :  { %v2642_v52 = vpop.f32.mrb[30].mxu0  ;;  %v2641_v7 = vadd.f32 %v2640_v51, %v2521_v0 }
 0xe41   :  { %v2645_v53 = vmax.f32 %v2639_v50, 0.0  ;;  %v2643_v54 = vpop.f32.mrb[31].mxu0 }
 0xe43   :  { %v2646_v55 = vpack.c.bf16 %v2645_v53, %v2645_v53 }
 0xe45   :  { %3779 = vmatmul.mubr.bf16.vlgmr.msra.gmra.mrb[40].mxu1 %v2646_v55 }
 0xe46   :  { %3818 = vmatprep.mubr.msk.bf16.mxu1 %vm4286_vm0, %v4285_v3  ;;  %3803 = vmatpush3.bf16.msra.mxu1 %v4204_v58 }
 0xe47   :  { %3804 = vmatprep.subr.bf16.mxu1 %v4285_v3 }
 0xe4a   :  { %3805 = vmatpush3.bf16.msra.mxu1 %v4205_v59 }
 0xe4b   :  { %3806 = vmatprep.subr.bf16.mxu1 %v4285_v3 }
 0xe4e   :  { %3807 = vmatpush3.bf16.msra.mxu1 %v4206_v60 }
 0xe4f   :  { %3808 = vmatprep.subr.bf16.mxu1 %v4285_v3 }
 0xe52   :  { %3809 = vmatpush3.bf16.msra.mxu1 %v4207_v61 }
 0xe53   :  { %3810 = vmatprep.subr.bf16.mxu1 %v4285_v3 }
 0xe56   :  { %3811 = vmatpush3.bf16.msra.mxu1 %v4208_v62 }
 0xe57   :  { %3812 = vmatprep.subr.bf16.mxu1 %v4285_v3 }
 0xe5a   :  { %3813 = vmatpush3.bf16.msra.mxu1 %v4209_v63 }
 0xe5b   :  { %3814 = vmatprep.subr.bf16.mxu1 %v4285_v3 }
 0xe5e   :  { %3815 = vmatpush3.bf16.msra.mxu1 %v4210_v44 }
 0xe5f   :  { %3816 = vmatprep.subr.bf16.mxu1 %v4285_v3 }
 0xe62   :  { %3817 = vmatpush3.bf16.msra.mxu1 %v4211_v13 }
 0xf18   :  { %v2752_v1 = vpop.f32.mrb[40].mxu1 }
 0xf19   :  { %v2753_v4 = vadd.f32 %v3392_v2, %v2752_v1  ;;  %v3780_v5 = vpop.f32.mrb[41].mxu1 }
 0xf1a   :  { %v2755_v6 = vpop.f32.mrb[42].mxu1 }
 0xf1b   :  { %v2758_v8 = vmax.f32 %v2753_v4, 0.0  ;;  %v3781_v9 = vpop.f32.mrb[43].mxu1 }
 0xf1d   :  { %v2759_v10 = vadd.f32 %v2758_v8, %v2641_v7 }
 0xf1f   :  { %v2760_v11 = vmax.f32 %v2759_v10, 0.0 }
 0xf21   :  { %v2761_v12 = vpack.c.bf16 %v2760_v11, %v2760_v11 }
 0xf23   :  { %3799 = vmatmul.mubr.bf16.vlgmr.msra.gmra.mrb[32].mxu0 %v2761_v12 }
 0xf24   :  { %3838 = vmatprep.mubr.msk.bf16.mxu0 %vm4286_vm0, %v4285_v3  ;;  %3823 = vmatpush3.bf16.msra.mxu0 %v4212_v14 }
 0xf25   :  { %3824 = vmatprep.subr.bf16.mxu0 %v4285_v3 }
 0xf28   :  { %3825 = vmatpush3.bf16.msra.mxu0 %v4213_v15 }
 0xf29   :  { %3826 = vmatprep.subr.bf16.mxu0 %v4285_v3 }
 0xf2c   :  { %3827 = vmatpush3.bf16.msra.mxu0 %v4214_v16 }
 0xf2d   :  { %3828 = vmatprep.subr.bf16.mxu0 %v4285_v3 }
 0xf30   :  { %3829 = vmatpush3.bf16.msra.mxu0 %v4215_v17 }
 0xf31   :  { %3830 = vmatprep.subr.bf16.mxu0 %v4285_v3 }
 0xf34   :  { %3831 = vmatpush3.bf16.msra.mxu0 %v4216_v18 }
 0xf35   :  { %3832 = vmatprep.subr.bf16.mxu0 %v4285_v3 }
 0xf38   :  { %3833 = vmatpush3.bf16.msra.mxu0 %v4217_v27 }
 0xf39   :  { %3834 = vmatprep.subr.bf16.mxu0 %v4285_v3 }
 0xf3c   :  { %3835 = vmatpush3.bf16.msra.mxu0 %v4218_v28 }
 0xf3d   :  { %3836 = vmatprep.subr.bf16.mxu0 %v4285_v3 }
 0xf40   :  { %3837 = vmatpush3.bf16.msra.mxu0 %v4219_v29 }
 0xff6   :  { %v2867_v20 = vpop.f32.mrb[32].mxu0 }
 0xff7   :  { %v2868_v21 = vadd.f32 %v3401_v19, %v2867_v20  ;;  %v3800_v22 = vpop.f32.mrb[33].mxu0 }
 0xff8   :  { %v2870_v23 = vpop.f32.mrb[34].mxu0 }
 0xff9   :  { %v2873_v24 = vmax.f32 %v2868_v21, 0.0  ;;  %v3801_v25 = vpop.f32.mrb[35].mxu0 }
 0xffb   :  { %v2874_v26 = vpack.c.bf16 %v2873_v24, %v2873_v24 }
 0xffd   :  { %3819 = vmatmul.mubr.bf16.vlgmr.msra.gmra.mrb[44].mxu1 %v2874_v26 }
0x10d0   :  { %v2980_v31 = vpop.f32.mrb[44].mxu1 }
0x10d1   :  { %v2981_v32 = vadd.f32 %v3410_v30, %v2980_v31  ;;  %v3820_v33 = vpop.f32.mrb[45].mxu1 }
0x10d2   :  { %v2983_v34 = vpop.f32.mrb[46].mxu1 }
0x10d3   :  { %v2986_v35 = vmax.f32 %v2981_v32, 0.0  ;;  %v3821_v36 = vpop.f32.mrb[47].mxu1 }
0x10d5   :  { %v2987_v37 = vadd.f32 %v2986_v35, %v2760_v11 }
0x10d7   :  { %v2988_v38 = vmax.f32 %v2987_v37, 0.0 }
0x10d9   :  { %v2989_v39 = vpack.c.bf16 %v2988_v38, %v2988_v38 }
0x10db   :  { %3839 = vmatmul.mubr.bf16.vlgmr.msra.gmra.mrb[36].mxu0 %v2989_v39 }
0x11ae   :  { %v3095_v41 = vpop.f32.mrb[36].mxu0 }
0x11af   :  { %v3096_v43 = vadd.f32 %v3419_v40, %v3095_v41  ;;  %v3840_v45 = vpop.f32.mrb[37].mxu0 }
0x11b0   :  { %v3098_v3 = vpop.f32.mrb[38].mxu0 }
0x11b1   :  { %3101 = vst [vmem:[#allocation2] sm:$0xff] %v3096_v43  ;;  %v3841_v46 = vpop.f32.mrb[39].mxu0 }
0x11b2   :  { %4231 = shalt.err (!%p4228_p4)
}
0x11b3   :  { %s4232_s20 = scalar_lea.hbm %s4496_s27, 128 }
0x11b4   :  { %p4233_p5 = scmp.ne.s32.totalorder %s4496_s27, %s4232_s20  ;;  %p4236_p6 = scmp.lt.u32.totalorder %s4232_s20, %s4496_s27 }
0x11b6   :  { %p4238_p7 = pnand %p4236_p6, %p4233_p5 }
0x11b8   :  { %4241 = shalt.err (!%p4238_p7)
}
0x11b9   :  { %3111 = dma.vmem_to_hbm [thread:$0]  %s3109_s22, 128, %s4496_s27, [#allocation3]  }
0x11ba   :  { %4242 = dma.done.wait [#allocation3], 128  }
0x11bb   :  { %4243 = vsyncadd [#allocation3], 4294967168 }
0x11bc   :  { %3115 = vsyncpa [#allocation3], 1 }

</bundles_post_ra>
